<compile_context>
chip_gen: v5e
topology: v5e:2x2
jax: 0.10.0
libtpu: 0.0.40
codegen_flags: <defaults>
</compile_context>

<pallas_src>
import jax
import jax.numpy as jnp
from jax.experimental import pallas as pl
from jax.experimental.pallas import tpu as pltpu

# ---- model hyper-parameters (small, consistent with the module) ------------
N_EMBD = 32          # n_embd
N_HEAD = 2           # n_head
N_LAYER = 2          # n_layer
BLOCK_SIZE = 8       # block_size == T
VOCAB_SIZE = 16      # vocab_size
HEAD_SIZE = N_EMBD // N_HEAD
LN_EPS = 1e-5        # PyTorch nn.LayerNorm default

V_PAD = 128          # lane-dense padded vocab for the output store
BB_MAX = 512         # batch elements per grid step (sized for v7x 64 MiB VMEM)


# ---------------------------------------------------------------------------
# Pallas kernel: full transformer stack for a block of BB batch elements.
# ---------------------------------------------------------------------------
def gpt_kernel(
    x_ref,        # (BB, T, C)   embedded input (tok_emb + pos_emb)
    wqkv_ref,     # (L, C, 3C)   packed [Q(all heads) | K | V]
    wproj_ref,    # (L, C, C)
    vecs_ref,     # (L, 6, C)    [ln1_g, ln1_b, ln2_g, ln2_b, bproj, b2]
    w1_ref,       # (L, C, 4C)
    b1_ref,       # (L, 1, 4C)
    w2_ref,       # (L, 4C, C)
    lnf_ref,      # (2, C)       [lnf_g, lnf_b]
    wlm_ref,      # (C, V_PAD)   zero-padded lm_head weight
    blm_ref,      # (1, V_PAD)   zero-padded lm_head bias
    out_ref,      # (BB, T, V_PAD)
):
    bb, t, c = x_ref.shape
    n = bb * t
    hs = HEAD_SIZE

    # (BB, T, C) -> (BB*T, C): free leading-dim merge (T is a sublane multiple)
    x = x_ref[...].reshape(n, c)

    wqkv = wqkv_ref[...]
    wproj = wproj_ref[...]
    vecs = vecs_ref[...]
    w1 = w1_ref[...]
    b1 = b1_ref[...]
    w2 = w2_ref[...]
    lnf = lnf_ref[...]
    wlm = wlm_ref[...]
    blm = blm_ref[0]

    def layernorm(v, g, b):
        mu = jnp.mean(v, axis=-1, keepdims=True)
        var = jnp.mean((v - mu) * (v - mu), axis=-1, keepdims=True)
        return (v - mu) * jax.lax.rsqrt(var + LN_EPS) * g + b

    scale = hs ** (-0.5)

    for l in range(N_LAYER):
        ln1g, ln1b = vecs[l, 0], vecs[l, 1]
        ln2g, ln2b = vecs[l, 2], vecs[l, 3]
        bproj, b2 = vecs[l, 4], vecs[l, 5]

        # --- multi-head self-attention (pre-LN, non-causal per reference) ---
        xn = layernorm(x, ln1g, ln1b)                                # (N, C)
        qkv = jnp.dot(xn, wqkv[l],
                      preferred_element_type=jnp.float32)            # (N, 3C)

        sa = jnp.zeros((n, c), jnp.float32)
        for h in range(N_HEAD):
            q = qkv[:, h * hs:(h + 1) * hs].reshape(bb, t, hs)
            k = qkv[:, c + h * hs: c + (h + 1) * hs].reshape(bb, t, hs)
            v = qkv[:, 2 * c + h * hs: 2 * c + (h + 1) * hs].reshape(bb, t, hs)

            s = jnp.einsum("bqd,bkd->bqk", q, k,
                           preferred_element_type=jnp.float32) * scale
            s = s - jnp.max(s, axis=-1, keepdims=True)
            p = jnp.exp(s)
            p = p * pl.reciprocal(jnp.sum(p, axis=-1, keepdims=True),
                                  approx=True)                       # softmax
            o = jnp.einsum("bqk,bkd->bqd", p, v,
                           preferred_element_type=jnp.float32)       # (BB,T,HS)

            # accumulate this head through its slice of wproj (no lane concat)
            sa = sa + jnp.dot(o.reshape(n, hs),
                              wproj[l, h * hs:(h + 1) * hs, :],
                              preferred_element_type=jnp.float32)
        x = x + sa + bproj

        # --- feed-forward (pre-LN) ------------------------------------------
        xn2 = layernorm(x, ln2g, ln2b)
        h1 = jnp.dot(xn2, w1[l], preferred_element_type=jnp.float32) + b1[l, 0]
        h1 = jnp.maximum(h1, 0.0)                                    # ReLU
        ff = jnp.dot(h1, w2[l], preferred_element_type=jnp.float32) + b2
        x = x + ff

    # --- final LN + lm_head (lane-dense padded vocab) -----------------------
    xf = layernorm(x, lnf[0], lnf[1])
    logits = jnp.dot(xf, wlm, preferred_element_type=jnp.float32) + blm
    out_ref[...] = logits.reshape(bb, t, V_PAD)


# ---------------------------------------------------------------------------
# Wrapper
# ---------------------------------------------------------------------------
@jax.jit
def gpt_forward(idx, params):
    """idx: (B, T) int32 token ids. Returns logits (B, T, vocab_size)."""
    B, T = idx.shape

    # Glue: embedding gathers + positional add (plain JAX).
    tok_emb = params["tok_emb"][idx]                          # (B, T, C)
    pos_emb = params["pos_emb"][jnp.arange(T)]                # (T, C)
    x0 = (tok_emb + pos_emb).astype(jnp.float32)              # (B, T, C)

    # Batch-block the grid; pad B up to a multiple of BB.
    BB = min(BB_MAX, B)
    B_pad = int(pl.cdiv(B, BB)) * BB
    if B_pad != B:
        x0 = jnp.pad(x0, ((0, B_pad - B), (0, 0), (0, 0)))

    # --- pack weights (cheap, done under jit) --------------------------------
    def pack_heads(w):  # (L, H, C, HS) -> (L, C, H*HS)
        return jnp.moveaxis(w, 1, 2).reshape(N_LAYER, N_EMBD, N_EMBD)

    wqkv = jnp.concatenate(
        [pack_heads(params["wq"]), pack_heads(params["wk"]),
         pack_heads(params["wv"])], axis=-1)                   # (L, C, 3C)
    vecs = jnp.stack(
        [params["ln1_g"], params["ln1_b"], params["ln2_g"], params["ln2_b"],
         params["bproj"], params["b2"]], axis=1)               # (L, 6, C)
    b1 = params["b1"][:, None, :]                              # (L, 1, 4C)
    lnf = jnp.stack([params["lnf_g"][0], params["lnf_b"][0]], axis=0)  # (2, C)
    wlm_pad = jnp.pad(params["wlm"],
                      ((0, 0), (0, V_PAD - VOCAB_SIZE)))       # (C, 128)
    blm_pad = jnp.pad(params["blm"],
                      ((0, 0), (0, V_PAD - VOCAB_SIZE)))       # (1, 128)

    weights = [wqkv, params["wproj"], vecs, params["w1"], b1, params["w2"],
               lnf, wlm_pad, blm_pad]

    in_specs = [pl.BlockSpec((BB, T, N_EMBD), lambda b: (b, 0, 0))]
    in_specs += [
        pl.BlockSpec(w.shape, lambda b, _n=w.ndim: (0,) * _n) for w in weights
    ]

    out = pl.pallas_call(
        gpt_kernel,
        out_shape=jax.ShapeDtypeStruct((B_pad, T, V_PAD), jnp.float32),
        grid=(B_pad // BB,),
        in_specs=in_specs,
        out_specs=pl.BlockSpec((BB, T, V_PAD), lambda b: (b, 0, 0)),
        compiler_params=pltpu.CompilerParams(
            dimension_semantics=("parallel",)),
    )(x0, *weights)

    return out[:B, :, :VOCAB_SIZE]


# ---------------------------------------------------------------------------
# Deterministic parameter init (mirrors _init_weights: normal(0, 0.02) for
# Linear weights & Embeddings, zeros for biases; LayerNorm gamma=1, beta=0).
# ---------------------------------------------------------------------------
def init_params(key):
    ks = iter(jax.random.split(key, 64))

    def nrm(shape):
        return (0.02 * jax.random.normal(next(ks), shape)).astype(jnp.float32)

    C, H, HS, L, V, T = N_EMBD, N_HEAD, HEAD_SIZE, N_LAYER, VOCAB_SIZE, BLOCK_SIZE
    params = {
        "tok_emb": nrm((V, C)),
        "pos_emb": nrm((T, C)),
        "ln1_g": jnp.ones((L, C), jnp.float32),
        "ln1_b": jnp.zeros((L, C), jnp.float32),
        "wq": nrm((L, H, C, HS)),
        "wk": nrm((L, H, C, HS)),
        "wv": nrm((L, H, C, HS)),
        "wproj": nrm((L, C, C)),
        "bproj": jnp.zeros((L, C), jnp.float32),
        "ln2_g": jnp.ones((L, C), jnp.float32),
        "ln2_b": jnp.zeros((L, C), jnp.float32),
        "w1": nrm((L, C, 4 * C)),
        "b1": jnp.zeros((L, 4 * C), jnp.float32),
        "w2": nrm((L, 4 * C, C)),
        "b2": jnp.zeros((L, C), jnp.float32),
        "lnf_g": jnp.ones((1, C), jnp.float32),
        "lnf_b": jnp.zeros((1, C), jnp.float32),
        "wlm": nrm((C, V)),
        "blm": jnp.zeros((1, V), jnp.float32),
    }
    return params


# ---------------------------------------------------------------------------
# Pure-JAX reference (same math) for a correctness spot-check.
# ---------------------------------------------------------------------------
def gpt_reference(idx, p):
    B, T = idx.shape
    x = p["tok_emb"][idx] + p["pos_emb"][jnp.arange(T)]

    def ln(v, g, b):
        mu = jnp.mean(v, -1, keepdims=True)
        var = jnp.mean((v - mu) ** 2, -1, keepdims=True)
        return (v - mu) * jax.lax.rsqrt(var + LN_EPS) * g + b

    hp = jax.lax.Precision.HIGHEST
    for l in range(N_LAYER):
        xn = ln(x, p["ln1_g"][l], p["ln1_b"][l])
        outs = []
        for h in range(N_HEAD):
            q = jnp.einsum("btc,cd->btd", xn, p["wq"][l, h], precision=hp)
            k = jnp.einsum("btc,cd->btd", xn, p["wk"][l, h], precision=hp)
            v = jnp.einsum("btc,cd->btd", xn, p["wv"][l, h], precision=hp)
            s = jnp.einsum("bqd,bkd->bqk", q, k, precision=hp) * HEAD_SIZE ** -0.5
            w = jax.nn.softmax(s, axis=-1)
            outs.append(jnp.einsum("bqk,bkd->bqd", w, v, precision=hp))
        sa = jnp.concatenate(outs, -1)
        sa = jnp.einsum("btc,cd->btd", sa, p["wproj"][l], precision=hp) + p["bproj"][l]
        x = x + sa
        xn2 = ln(x, p["ln2_g"][l], p["ln2_b"][l])
        h1 = jnp.maximum(
            jnp.einsum("btc,cd->btd", xn2, p["w1"][l], precision=hp) + p["b1"][l], 0.0)
        ff = jnp.einsum("btc,cd->btd", h1, p["w2"][l], precision=hp) + p["b2"][l]
        x = x + ff
    xf = ln(x, p["lnf_g"][0], p["lnf_b"][0])
    return jnp.einsum("btc,cv->btv", xf, p["wlm"], precision=hp) + p["blm"][0]


if __name__ == "__main__":
    key = jax.random.PRNGKey(0)
    pkey, ikey = jax.random.split(key)
    params = init_params(pkey)

    B, T = 2, BLOCK_SIZE
    idx = jax.random.randint(ikey, (B, T), 0, VOCAB_SIZE, dtype=jnp.int32)

    logits = gpt_forward(idx, params)
    logits = jax.block_until_ready(logits)
    assert logits.shape == (B, T, VOCAB_SIZE)
    assert logits.dtype == jnp.float32

    ref = gpt_reference(idx, params)
    err = float(jnp.max(jnp.abs(logits - ref)))
    assert err < 1e-2, f"max abs error vs reference = {err}"

    print("KERNEL_OK")
</pallas_src>

<mosaic_0001>
module attributes {stable_mosaic.version = 11 : i64} {
  func.func @gpt_kernel(%arg0: i32, %arg1: memref<2x8x32xf32, #tpu.memory_space<vmem>>, %arg2: memref<2x32x96xf32, #tpu.memory_space<vmem>>, %arg3: memref<2x32x32xf32, #tpu.memory_space<vmem>>, %arg4: memref<2x6x32xf32, #tpu.memory_space<vmem>>, %arg5: memref<2x32x128xf32, #tpu.memory_space<vmem>>, %arg6: memref<2x1x128xf32, #tpu.memory_space<vmem>>, %arg7: memref<2x128x32xf32, #tpu.memory_space<vmem>>, %arg8: memref<2x32xf32, #tpu.memory_space<vmem>>, %arg9: memref<32x128xf32, #tpu.memory_space<vmem>>, %arg10: memref<1x128xf32, #tpu.memory_space<vmem>>, %arg11: memref<2x8x128xf32, #tpu.memory_space<vmem>>) attributes {dimension_semantics = [#tpu.dimension_semantics<parallel>], iteration_bounds = array<i64: 1>, scalar_prefetch = 0 : i64, scratch_operands = 0 : i64, tpu.core_type = #tpu.core_type<tc>, window_params = [{transform_indices = @transform_0, window_bounds = array<i64: 2, 8, 32>}, {pipeline_mode = #tpu.pipeline_mode<synchronous>, transform_indices = @transform_1, window_bounds = array<i64: 2, 32, 96>}, {pipeline_mode = #tpu.pipeline_mode<synchronous>, transform_indices = @transform_2, window_bounds = array<i64: 2, 32, 32>}, {pipeline_mode = #tpu.pipeline_mode<synchronous>, transform_indices = @transform_3, window_bounds = array<i64: 2, 6, 32>}, {pipeline_mode = #tpu.pipeline_mode<synchronous>, transform_indices = @transform_4, window_bounds = array<i64: 2, 32, 128>}, {pipeline_mode = #tpu.pipeline_mode<synchronous>, transform_indices = @transform_5, window_bounds = array<i64: 2, 1, 128>}, {pipeline_mode = #tpu.pipeline_mode<synchronous>, transform_indices = @transform_6, window_bounds = array<i64: 2, 128, 32>}, {pipeline_mode = #tpu.pipeline_mode<synchronous>, transform_indices = @transform_7, window_bounds = array<i64: 2, 32>}, {pipeline_mode = #tpu.pipeline_mode<synchronous>, transform_indices = @transform_8, window_bounds = array<i64: 32, 128>}, {pipeline_mode = #tpu.pipeline_mode<synchronous>, transform_indices = @transform_9, window_bounds = array<i64: 1, 128>}, {transform_indices = @transform_10, window_bounds = array<i64: 2, 8, 128>}]} {
    %c0 = arith.constant 0 : index
    %c0_0 = arith.constant 0 : index
    %c0_1 = arith.constant 0 : index
    %0 = vector.load %arg1[%c0, %c0_0, %c0_1] : memref<2x8x32xf32, #tpu.memory_space<vmem>>, vector<2x8x32xf32>
    %1 = vector.shape_cast %0 : vector<2x8x32xf32> to vector<16x32xf32>
    %c0_2 = arith.constant 0 : index
    %c0_3 = arith.constant 0 : index
    %c0_4 = arith.constant 0 : index
    %2 = vector.load %arg2[%c0_2, %c0_3, %c0_4] : memref<2x32x96xf32, #tpu.memory_space<vmem>>, vector<2x32x96xf32>
    %c0_5 = arith.constant 0 : index
    %c0_6 = arith.constant 0 : index
    %c0_7 = arith.constant 0 : index
    %3 = vector.load %arg3[%c0_5, %c0_6, %c0_7] : memref<2x32x32xf32, #tpu.memory_space<vmem>>, vector<2x32x32xf32>
    %c0_8 = arith.constant 0 : index
    %c0_9 = arith.constant 0 : index
    %c0_10 = arith.constant 0 : index
    %4 = vector.load %arg4[%c0_8, %c0_9, %c0_10] : memref<2x6x32xf32, #tpu.memory_space<vmem>>, vector<2x6x32xf32>
    %c0_11 = arith.constant 0 : index
    %c0_12 = arith.constant 0 : index
    %c0_13 = arith.constant 0 : index
    %5 = vector.load %arg5[%c0_11, %c0_12, %c0_13] : memref<2x32x128xf32, #tpu.memory_space<vmem>>, vector<2x32x128xf32>
    %c0_14 = arith.constant 0 : index
    %c0_15 = arith.constant 0 : index
    %c0_16 = arith.constant 0 : index
    %6 = vector.load %arg6[%c0_14, %c0_15, %c0_16] : memref<2x1x128xf32, #tpu.memory_space<vmem>>, vector<2x1x128xf32>
    %c0_17 = arith.constant 0 : index
    %c0_18 = arith.constant 0 : index
    %c0_19 = arith.constant 0 : index
    %7 = vector.load %arg7[%c0_17, %c0_18, %c0_19] : memref<2x128x32xf32, #tpu.memory_space<vmem>>, vector<2x128x32xf32>
    %c0_20 = arith.constant 0 : index
    %c0_21 = arith.constant 0 : index
    %8 = vector.load %arg8[%c0_20, %c0_21] : memref<2x32xf32, #tpu.memory_space<vmem>>, vector<2x32xf32>
    %c0_22 = arith.constant 0 : index
    %c0_23 = arith.constant 0 : index
    %9 = vector.load %arg9[%c0_22, %c0_23] : memref<32x128xf32, #tpu.memory_space<vmem>>, vector<32x128xf32>
    %c0_24 = arith.constant 0 : index
    %c0_25 = arith.constant 0 : index
    %10 = vector.load %arg10[%c0_24, %c0_25] : memref<1x128xf32, #tpu.memory_space<vmem>>, vector<1x128xf32>
    %11 = vector.shape_cast %10 : vector<1x128xf32> to vector<128xf32>
    %12 = vector.extract_strided_slice %4 {offsets = [0, 0, 0], sizes = [1, 1, 32], strides = [1, 1, 1]} : vector<2x6x32xf32> to vector<1x1x32xf32>
    %13 = vector.shape_cast %12 : vector<1x1x32xf32> to vector<32xf32>
    %14 = vector.extract_strided_slice %4 {offsets = [0, 1, 0], sizes = [1, 1, 32], strides = [1, 1, 1]} : vector<2x6x32xf32> to vector<1x1x32xf32>
    %15 = vector.shape_cast %14 : vector<1x1x32xf32> to vector<32xf32>
    %16 = vector.extract_strided_slice %4 {offsets = [0, 2, 0], sizes = [1, 1, 32], strides = [1, 1, 1]} : vector<2x6x32xf32> to vector<1x1x32xf32>
    %17 = vector.shape_cast %16 : vector<1x1x32xf32> to vector<32xf32>
    %18 = vector.extract_strided_slice %4 {offsets = [0, 3, 0], sizes = [1, 1, 32], strides = [1, 1, 1]} : vector<2x6x32xf32> to vector<1x1x32xf32>
    %19 = vector.shape_cast %18 : vector<1x1x32xf32> to vector<32xf32>
    %20 = vector.extract_strided_slice %4 {offsets = [0, 4, 0], sizes = [1, 1, 32], strides = [1, 1, 1]} : vector<2x6x32xf32> to vector<1x1x32xf32>
    %21 = vector.shape_cast %20 : vector<1x1x32xf32> to vector<32xf32>
    %22 = vector.extract_strided_slice %4 {offsets = [0, 5, 0], sizes = [1, 1, 32], strides = [1, 1, 1]} : vector<2x6x32xf32> to vector<1x1x32xf32>
    %23 = vector.shape_cast %22 : vector<1x1x32xf32> to vector<32xf32>
    %cst = arith.constant dense<0.000000e+00> : vector<16xf32>
    %24 = vector.multi_reduction <add>, %1, %cst [1] : vector<16x32xf32> to vector<16xf32>
    %25 = vector.shape_cast %24 : vector<16xf32> to vector<16x1xf32>
    %cst_26 = arith.constant 3.200000e+01 : f32
    %26 = vector.broadcast %cst_26 : f32 to vector<16x1xf32>
    %27 = arith.divf %25, %26 : vector<16x1xf32>
    %28 = vector.broadcast %27 : vector<16x1xf32> to vector<16x32xf32>
    %29 = arith.subf %1, %28 : vector<16x32xf32>
    %30 = vector.broadcast %27 : vector<16x1xf32> to vector<16x32xf32>
    %31 = arith.subf %1, %30 : vector<16x32xf32>
    %32 = arith.mulf %29, %31 : vector<16x32xf32>
    %cst_27 = arith.constant dense<0.000000e+00> : vector<16xf32>
    %33 = vector.multi_reduction <add>, %32, %cst_27 [1] : vector<16x32xf32> to vector<16xf32>
    %34 = vector.shape_cast %33 : vector<16xf32> to vector<16x1xf32>
    %cst_28 = arith.constant 3.200000e+01 : f32
    %35 = vector.broadcast %cst_28 : f32 to vector<16x1xf32>
    %36 = arith.divf %34, %35 : vector<16x1xf32>
    %37 = vector.broadcast %27 : vector<16x1xf32> to vector<16x32xf32>
    %38 = arith.subf %1, %37 : vector<16x32xf32>
    %cst_29 = arith.constant 9.99999974E-6 : f32
    %39 = vector.broadcast %cst_29 : f32 to vector<16x1xf32>
    %40 = arith.addf %36, %39 : vector<16x1xf32>
    %41 = math.rsqrt %40 : vector<16x1xf32>
    %42 = vector.broadcast %41 : vector<16x1xf32> to vector<16x32xf32>
    %43 = arith.mulf %38, %42 : vector<16x32xf32>
    %44 = vector.shape_cast %13 : vector<32xf32> to vector<1x32xf32>
    %45 = vector.broadcast %44 : vector<1x32xf32> to vector<16x32xf32>
    %46 = arith.mulf %43, %45 : vector<16x32xf32>
    %47 = vector.shape_cast %15 : vector<32xf32> to vector<1x32xf32>
    %48 = vector.broadcast %47 : vector<1x32xf32> to vector<16x32xf32>
    %49 = arith.addf %46, %48 : vector<16x32xf32>
    %50 = vector.extract_strided_slice %2 {offsets = [0, 0, 0], sizes = [1, 32, 96], strides = [1, 1, 1]} : vector<2x32x96xf32> to vector<1x32x96xf32>
    %51 = vector.shape_cast %50 : vector<1x32x96xf32> to vector<32x96xf32>
    %cst_30 = arith.constant dense<0.000000e+00> : vector<16x96xf32>
    %52 = tpu.matmul %49, %51, %cst_30 {dimension_numbers = #tpu.dot_dimension_numbers<[1], [0], [0], [1], [0, 0, 1, 1], [], []>} : vector<16x32xf32>, vector<32x96xf32>, vector<16x96xf32> -> vector<16x96xf32>
    %cst_31 = arith.constant 0.000000e+00 : f32
    %53 = vector.broadcast %cst_31 : f32 to vector<16x32xf32>
    %54 = vector.extract_strided_slice %52 {offsets = [0, 0], sizes = [16, 16], strides = [1, 1]} : vector<16x96xf32> to vector<16x16xf32>
    %55 = vector.shape_cast %54 : vector<16x16xf32> to vector<2x8x16xf32>
    %56 = vector.extract_strided_slice %52 {offsets = [0, 32], sizes = [16, 16], strides = [1, 1]} : vector<16x96xf32> to vector<16x16xf32>
    %57 = vector.shape_cast %56 : vector<16x16xf32> to vector<2x8x16xf32>
    %58 = vector.extract_strided_slice %52 {offsets = [0, 64], sizes = [16, 16], strides = [1, 1]} : vector<16x96xf32> to vector<16x16xf32>
    %59 = vector.shape_cast %58 : vector<16x16xf32> to vector<2x8x16xf32>
    "tpu.trace_start"() <{level = 10 : i32, message = "bqd,bkd->bqk"}> : () -> ()
    %cst_32 = arith.constant dense<0.000000e+00> : vector<2x8x8xf32>
    %60 = tpu.matmul %55, %57, %cst_32 {dimension_numbers = #tpu.dot_dimension_numbers<[2], [2], [1], [1], [0, 0, 0, 1, 1, 1], [0], [0]>} : vector<2x8x16xf32>, vector<2x8x16xf32>, vector<2x8x8xf32> -> vector<2x8x8xf32>
    "tpu.trace_stop"() : () -> ()
    %cst_33 = arith.constant 2.500000e-01 : f32
    %61 = vector.broadcast %cst_33 : f32 to vector<2x8x8xf32>
    %62 = arith.mulf %60, %61 : vector<2x8x8xf32>
    %cst_34 = arith.constant dense<0xFF800000> : vector<2x8xf32>
    %63 = vector.multi_reduction <maximumf>, %62, %cst_34 [2] : vector<2x8x8xf32> to vector<2x8xf32>
    %64 = vector.shape_cast %63 : vector<2x8xf32> to vector<2x8x1xf32>
    %65 = vector.broadcast %64 : vector<2x8x1xf32> to vector<2x8x8xf32>
    %66 = arith.subf %62, %65 : vector<2x8x8xf32>
    %67 = math.exp %66 : vector<2x8x8xf32>
    %cst_35 = arith.constant dense<0.000000e+00> : vector<2x8xf32>
    %68 = vector.multi_reduction <add>, %67, %cst_35 [2] : vector<2x8x8xf32> to vector<2x8xf32>
    %69 = vector.shape_cast %68 : vector<2x8xf32> to vector<2x8x1xf32>
    %70 = tpu.reciprocal %69 {approx = true} : vector<2x8x1xf32> -> vector<2x8x1xf32>
    %71 = vector.broadcast %70 : vector<2x8x1xf32> to vector<2x8x8xf32>
    %72 = arith.mulf %67, %71 : vector<2x8x8xf32>
    "tpu.trace_start"() <{level = 10 : i32, message = "bqk,bkd->bqd"}> : () -> ()
    %cst_36 = arith.constant dense<0.000000e+00> : vector<2x8x16xf32>
    %73 = tpu.matmul %72, %59, %cst_36 {dimension_numbers = #tpu.dot_dimension_numbers<[2], [1], [1], [2], [0, 0, 0, 1, 1, 2], [0], [0]>} : vector<2x8x8xf32>, vector<2x8x16xf32>, vector<2x8x16xf32> -> vector<2x8x16xf32>
    "tpu.trace_stop"() : () -> ()
    %74 = vector.shape_cast %73 : vector<2x8x16xf32> to vector<16x16xf32>
    %75 = vector.extract_strided_slice %3 {offsets = [0, 0, 0], sizes = [1, 16, 32], strides = [1, 1, 1]} : vector<2x32x32xf32> to vector<1x16x32xf32>
    %76 = vector.shape_cast %75 : vector<1x16x32xf32> to vector<16x32xf32>
    %cst_37 = arith.constant dense<0.000000e+00> : vector<16x32xf32>
    %77 = tpu.matmul %74, %76, %cst_37 {dimension_numbers = #tpu.dot_dimension_numbers<[1], [0], [0], [1], [0, 0, 1, 1], [], []>} : vector<16x16xf32>, vector<16x32xf32>, vector<16x32xf32> -> vector<16x32xf32>
    %78 = arith.addf %53, %77 : vector<16x32xf32>
    %79 = vector.extract_strided_slice %52 {offsets = [0, 16], sizes = [16, 16], strides = [1, 1]} : vector<16x96xf32> to vector<16x16xf32>
    %80 = vector.shape_cast %79 : vector<16x16xf32> to vector<2x8x16xf32>
    %81 = vector.extract_strided_slice %52 {offsets = [0, 48], sizes = [16, 16], strides = [1, 1]} : vector<16x96xf32> to vector<16x16xf32>
    %82 = vector.shape_cast %81 : vector<16x16xf32> to vector<2x8x16xf32>
    %83 = vector.extract_strided_slice %52 {offsets = [0, 80], sizes = [16, 16], strides = [1, 1]} : vector<16x96xf32> to vector<16x16xf32>
    %84 = vector.shape_cast %83 : vector<16x16xf32> to vector<2x8x16xf32>
    "tpu.trace_start"() <{level = 10 : i32, message = "bqd,bkd->bqk"}> : () -> ()
    %cst_38 = arith.constant dense<0.000000e+00> : vector<2x8x8xf32>
    %85 = tpu.matmul %80, %82, %cst_38 {dimension_numbers = #tpu.dot_dimension_numbers<[2], [2], [1], [1], [0, 0, 0, 1, 1, 1], [0], [0]>} : vector<2x8x16xf32>, vector<2x8x16xf32>, vector<2x8x8xf32> -> vector<2x8x8xf32>
    "tpu.trace_stop"() : () -> ()
    %cst_39 = arith.constant 2.500000e-01 : f32
    %86 = vector.broadcast %cst_39 : f32 to vector<2x8x8xf32>
    %87 = arith.mulf %85, %86 : vector<2x8x8xf32>
    %cst_40 = arith.constant dense<0xFF800000> : vector<2x8xf32>
    %88 = vector.multi_reduction <maximumf>, %87, %cst_40 [2] : vector<2x8x8xf32> to vector<2x8xf32>
    %89 = vector.shape_cast %88 : vector<2x8xf32> to vector<2x8x1xf32>
    %90 = vector.broadcast %89 : vector<2x8x1xf32> to vector<2x8x8xf32>
    %91 = arith.subf %87, %90 : vector<2x8x8xf32>
    %92 = math.exp %91 : vector<2x8x8xf32>
    %cst_41 = arith.constant dense<0.000000e+00> : vector<2x8xf32>
    %93 = vector.multi_reduction <add>, %92, %cst_41 [2] : vector<2x8x8xf32> to vector<2x8xf32>
    %94 = vector.shape_cast %93 : vector<2x8xf32> to vector<2x8x1xf32>
    %95 = tpu.reciprocal %94 {approx = true} : vector<2x8x1xf32> -> vector<2x8x1xf32>
    %96 = vector.broadcast %95 : vector<2x8x1xf32> to vector<2x8x8xf32>
    %97 = arith.mulf %92, %96 : vector<2x8x8xf32>
    "tpu.trace_start"() <{level = 10 : i32, message = "bqk,bkd->bqd"}> : () -> ()
    %cst_42 = arith.constant dense<0.000000e+00> : vector<2x8x16xf32>
    %98 = tpu.matmul %97, %84, %cst_42 {dimension_numbers = #tpu.dot_dimension_numbers<[2], [1], [1], [2], [0, 0, 0, 1, 1, 2], [0], [0]>} : vector<2x8x8xf32>, vector<2x8x16xf32>, vector<2x8x16xf32> -> vector<2x8x16xf32>
    "tpu.trace_stop"() : () -> ()
    %99 = vector.shape_cast %98 : vector<2x8x16xf32> to vector<16x16xf32>
    %100 = vector.extract_strided_slice %3 {offsets = [0, 16, 0], sizes = [1, 16, 32], strides = [1, 1, 1]} : vector<2x32x32xf32> to vector<1x16x32xf32>
    %101 = vector.shape_cast %100 : vector<1x16x32xf32> to vector<16x32xf32>
    %cst_43 = arith.constant dense<0.000000e+00> : vector<16x32xf32>
    %102 = tpu.matmul %99, %101, %cst_43 {dimension_numbers = #tpu.dot_dimension_numbers<[1], [0], [0], [1], [0, 0, 1, 1], [], []>} : vector<16x16xf32>, vector<16x32xf32>, vector<16x32xf32> -> vector<16x32xf32>
    %103 = arith.addf %78, %102 : vector<16x32xf32>
    %104 = arith.addf %1, %103 : vector<16x32xf32>
    %105 = vector.shape_cast %21 : vector<32xf32> to vector<1x32xf32>
    %106 = vector.broadcast %105 : vector<1x32xf32> to vector<16x32xf32>
    %107 = arith.addf %104, %106 : vector<16x32xf32>
    %cst_44 = arith.constant dense<0.000000e+00> : vector<16xf32>
    %108 = vector.multi_reduction <add>, %107, %cst_44 [1] : vector<16x32xf32> to vector<16xf32>
    %109 = vector.shape_cast %108 : vector<16xf32> to vector<16x1xf32>
    %cst_45 = arith.constant 3.200000e+01 : f32
    %110 = vector.broadcast %cst_45 : f32 to vector<16x1xf32>
    %111 = arith.divf %109, %110 : vector<16x1xf32>
    %112 = vector.broadcast %111 : vector<16x1xf32> to vector<16x32xf32>
    %113 = arith.subf %107, %112 : vector<16x32xf32>
    %114 = vector.broadcast %111 : vector<16x1xf32> to vector<16x32xf32>
    %115 = arith.subf %107, %114 : vector<16x32xf32>
    %116 = arith.mulf %113, %115 : vector<16x32xf32>
    %cst_46 = arith.constant dense<0.000000e+00> : vector<16xf32>
    %117 = vector.multi_reduction <add>, %116, %cst_46 [1] : vector<16x32xf32> to vector<16xf32>
    %118 = vector.shape_cast %117 : vector<16xf32> to vector<16x1xf32>
    %cst_47 = arith.constant 3.200000e+01 : f32
    %119 = vector.broadcast %cst_47 : f32 to vector<16x1xf32>
    %120 = arith.divf %118, %119 : vector<16x1xf32>
    %121 = vector.broadcast %111 : vector<16x1xf32> to vector<16x32xf32>
    %122 = arith.subf %107, %121 : vector<16x32xf32>
    %cst_48 = arith.constant 9.99999974E-6 : f32
    %123 = vector.broadcast %cst_48 : f32 to vector<16x1xf32>
    %124 = arith.addf %120, %123 : vector<16x1xf32>
    %125 = math.rsqrt %124 : vector<16x1xf32>
    %126 = vector.broadcast %125 : vector<16x1xf32> to vector<16x32xf32>
    %127 = arith.mulf %122, %126 : vector<16x32xf32>
    %128 = vector.shape_cast %17 : vector<32xf32> to vector<1x32xf32>
    %129 = vector.broadcast %128 : vector<1x32xf32> to vector<16x32xf32>
    %130 = arith.mulf %127, %129 : vector<16x32xf32>
    %131 = vector.shape_cast %19 : vector<32xf32> to vector<1x32xf32>
    %132 = vector.broadcast %131 : vector<1x32xf32> to vector<16x32xf32>
    %133 = arith.addf %130, %132 : vector<16x32xf32>
    %134 = vector.extract_strided_slice %5 {offsets = [0, 0, 0], sizes = [1, 32, 128], strides = [1, 1, 1]} : vector<2x32x128xf32> to vector<1x32x128xf32>
    %135 = vector.shape_cast %134 : vector<1x32x128xf32> to vector<32x128xf32>
    %cst_49 = arith.constant dense<0.000000e+00> : vector<16x128xf32>
    %136 = tpu.matmul %133, %135, %cst_49 {dimension_numbers = #tpu.dot_dimension_numbers<[1], [0], [0], [1], [0, 0, 1, 1], [], []>} : vector<16x32xf32>, vector<32x128xf32>, vector<16x128xf32> -> vector<16x128xf32>
    %137 = vector.extract_strided_slice %6 {offsets = [0, 0, 0], sizes = [1, 1, 128], strides = [1, 1, 1]} : vector<2x1x128xf32> to vector<1x1x128xf32>
    %138 = vector.shape_cast %137 : vector<1x1x128xf32> to vector<128xf32>
    %139 = vector.shape_cast %138 : vector<128xf32> to vector<1x128xf32>
    %140 = vector.broadcast %139 : vector<1x128xf32> to vector<16x128xf32>
    %141 = arith.addf %136, %140 : vector<16x128xf32>
    %cst_50 = arith.constant 0.000000e+00 : f32
    %142 = vector.broadcast %cst_50 : f32 to vector<16x128xf32>
    %143 = arith.maximumf %141, %142 : vector<16x128xf32>
    %144 = vector.extract_strided_slice %7 {offsets = [0, 0, 0], sizes = [1, 128, 32], strides = [1, 1, 1]} : vector<2x128x32xf32> to vector<1x128x32xf32>
    %145 = vector.shape_cast %144 : vector<1x128x32xf32> to vector<128x32xf32>
    %cst_51 = arith.constant dense<0.000000e+00> : vector<16x32xf32>
    %146 = tpu.matmul %143, %145, %cst_51 {dimension_numbers = #tpu.dot_dimension_numbers<[1], [0], [0], [1], [0, 0, 1, 1], [], []>} : vector<16x128xf32>, vector<128x32xf32>, vector<16x32xf32> -> vector<16x32xf32>
    %147 = vector.shape_cast %23 : vector<32xf32> to vector<1x32xf32>
    %148 = vector.broadcast %147 : vector<1x32xf32> to vector<16x32xf32>
    %149 = arith.addf %146, %148 : vector<16x32xf32>
    %150 = arith.addf %107, %149 : vector<16x32xf32>
    %151 = vector.extract_strided_slice %4 {offsets = [1, 0, 0], sizes = [1, 1, 32], strides = [1, 1, 1]} : vector<2x6x32xf32> to vector<1x1x32xf32>
    %152 = vector.shape_cast %151 : vector<1x1x32xf32> to vector<32xf32>
    %153 = vector.extract_strided_slice %4 {offsets = [1, 1, 0], sizes = [1, 1, 32], strides = [1, 1, 1]} : vector<2x6x32xf32> to vector<1x1x32xf32>
    %154 = vector.shape_cast %153 : vector<1x1x32xf32> to vector<32xf32>
    %155 = vector.extract_strided_slice %4 {offsets = [1, 2, 0], sizes = [1, 1, 32], strides = [1, 1, 1]} : vector<2x6x32xf32> to vector<1x1x32xf32>
    %156 = vector.shape_cast %155 : vector<1x1x32xf32> to vector<32xf32>
    %157 = vector.extract_strided_slice %4 {offsets = [1, 3, 0], sizes = [1, 1, 32], strides = [1, 1, 1]} : vector<2x6x32xf32> to vector<1x1x32xf32>
    %158 = vector.shape_cast %157 : vector<1x1x32xf32> to vector<32xf32>
    %159 = vector.extract_strided_slice %4 {offsets = [1, 4, 0], sizes = [1, 1, 32], strides = [1, 1, 1]} : vector<2x6x32xf32> to vector<1x1x32xf32>
    %160 = vector.shape_cast %159 : vector<1x1x32xf32> to vector<32xf32>
    %161 = vector.extract_strided_slice %4 {offsets = [1, 5, 0], sizes = [1, 1, 32], strides = [1, 1, 1]} : vector<2x6x32xf32> to vector<1x1x32xf32>
    %162 = vector.shape_cast %161 : vector<1x1x32xf32> to vector<32xf32>
    %cst_52 = arith.constant dense<0.000000e+00> : vector<16xf32>
    %163 = vector.multi_reduction <add>, %150, %cst_52 [1] : vector<16x32xf32> to vector<16xf32>
    %164 = vector.shape_cast %163 : vector<16xf32> to vector<16x1xf32>
    %cst_53 = arith.constant 3.200000e+01 : f32
    %165 = vector.broadcast %cst_53 : f32 to vector<16x1xf32>
    %166 = arith.divf %164, %165 : vector<16x1xf32>
    %167 = vector.broadcast %166 : vector<16x1xf32> to vector<16x32xf32>
    %168 = arith.subf %150, %167 : vector<16x32xf32>
    %169 = vector.broadcast %166 : vector<16x1xf32> to vector<16x32xf32>
    %170 = arith.subf %150, %169 : vector<16x32xf32>
    %171 = arith.mulf %168, %170 : vector<16x32xf32>
    %cst_54 = arith.constant dense<0.000000e+00> : vector<16xf32>
    %172 = vector.multi_reduction <add>, %171, %cst_54 [1] : vector<16x32xf32> to vector<16xf32>
    %173 = vector.shape_cast %172 : vector<16xf32> to vector<16x1xf32>
    %cst_55 = arith.constant 3.200000e+01 : f32
    %174 = vector.broadcast %cst_55 : f32 to vector<16x1xf32>
    %175 = arith.divf %173, %174 : vector<16x1xf32>
    %176 = vector.broadcast %166 : vector<16x1xf32> to vector<16x32xf32>
    %177 = arith.subf %150, %176 : vector<16x32xf32>
    %cst_56 = arith.constant 9.99999974E-6 : f32
    %178 = vector.broadcast %cst_56 : f32 to vector<16x1xf32>
    %179 = arith.addf %175, %178 : vector<16x1xf32>
    %180 = math.rsqrt %179 : vector<16x1xf32>
    %181 = vector.broadcast %180 : vector<16x1xf32> to vector<16x32xf32>
    %182 = arith.mulf %177, %181 : vector<16x32xf32>
    %183 = vector.shape_cast %152 : vector<32xf32> to vector<1x32xf32>
    %184 = vector.broadcast %183 : vector<1x32xf32> to vector<16x32xf32>
    %185 = arith.mulf %182, %184 : vector<16x32xf32>
    %186 = vector.shape_cast %154 : vector<32xf32> to vector<1x32xf32>
    %187 = vector.broadcast %186 : vector<1x32xf32> to vector<16x32xf32>
    %188 = arith.addf %185, %187 : vector<16x32xf32>
    %189 = vector.extract_strided_slice %2 {offsets = [1, 0, 0], sizes = [1, 32, 96], strides = [1, 1, 1]} : vector<2x32x96xf32> to vector<1x32x96xf32>
    %190 = vector.shape_cast %189 : vector<1x32x96xf32> to vector<32x96xf32>
    %cst_57 = arith.constant dense<0.000000e+00> : vector<16x96xf32>
    %191 = tpu.matmul %188, %190, %cst_57 {dimension_numbers = #tpu.dot_dimension_numbers<[1], [0], [0], [1], [0, 0, 1, 1], [], []>} : vector<16x32xf32>, vector<32x96xf32>, vector<16x96xf32> -> vector<16x96xf32>
    %cst_58 = arith.constant 0.000000e+00 : f32
    %192 = vector.broadcast %cst_58 : f32 to vector<16x32xf32>
    %193 = vector.extract_strided_slice %191 {offsets = [0, 0], sizes = [16, 16], strides = [1, 1]} : vector<16x96xf32> to vector<16x16xf32>
    %194 = vector.shape_cast %193 : vector<16x16xf32> to vector<2x8x16xf32>
    %195 = vector.extract_strided_slice %191 {offsets = [0, 32], sizes = [16, 16], strides = [1, 1]} : vector<16x96xf32> to vector<16x16xf32>
    %196 = vector.shape_cast %195 : vector<16x16xf32> to vector<2x8x16xf32>
    %197 = vector.extract_strided_slice %191 {offsets = [0, 64], sizes = [16, 16], strides = [1, 1]} : vector<16x96xf32> to vector<16x16xf32>
    %198 = vector.shape_cast %197 : vector<16x16xf32> to vector<2x8x16xf32>
    "tpu.trace_start"() <{level = 10 : i32, message = "bqd,bkd->bqk"}> : () -> ()
    %cst_59 = arith.constant dense<0.000000e+00> : vector<2x8x8xf32>
    %199 = tpu.matmul %194, %196, %cst_59 {dimension_numbers = #tpu.dot_dimension_numbers<[2], [2], [1], [1], [0, 0, 0, 1, 1, 1], [0], [0]>} : vector<2x8x16xf32>, vector<2x8x16xf32>, vector<2x8x8xf32> -> vector<2x8x8xf32>
    "tpu.trace_stop"() : () -> ()
    %cst_60 = arith.constant 2.500000e-01 : f32
    %200 = vector.broadcast %cst_60 : f32 to vector<2x8x8xf32>
    %201 = arith.mulf %199, %200 : vector<2x8x8xf32>
    %cst_61 = arith.constant dense<0xFF800000> : vector<2x8xf32>
    %202 = vector.multi_reduction <maximumf>, %201, %cst_61 [2] : vector<2x8x8xf32> to vector<2x8xf32>
    %203 = vector.shape_cast %202 : vector<2x8xf32> to vector<2x8x1xf32>
    %204 = vector.broadcast %203 : vector<2x8x1xf32> to vector<2x8x8xf32>
    %205 = arith.subf %201, %204 : vector<2x8x8xf32>
    %206 = math.exp %205 : vector<2x8x8xf32>
    %cst_62 = arith.constant dense<0.000000e+00> : vector<2x8xf32>
    %207 = vector.multi_reduction <add>, %206, %cst_62 [2] : vector<2x8x8xf32> to vector<2x8xf32>
    %208 = vector.shape_cast %207 : vector<2x8xf32> to vector<2x8x1xf32>
    %209 = tpu.reciprocal %208 {approx = true} : vector<2x8x1xf32> -> vector<2x8x1xf32>
    %210 = vector.broadcast %209 : vector<2x8x1xf32> to vector<2x8x8xf32>
    %211 = arith.mulf %206, %210 : vector<2x8x8xf32>
    "tpu.trace_start"() <{level = 10 : i32, message = "bqk,bkd->bqd"}> : () -> ()
    %cst_63 = arith.constant dense<0.000000e+00> : vector<2x8x16xf32>
    %212 = tpu.matmul %211, %198, %cst_63 {dimension_numbers = #tpu.dot_dimension_numbers<[2], [1], [1], [2], [0, 0, 0, 1, 1, 2], [0], [0]>} : vector<2x8x8xf32>, vector<2x8x16xf32>, vector<2x8x16xf32> -> vector<2x8x16xf32>
    "tpu.trace_stop"() : () -> ()
    %213 = vector.shape_cast %212 : vector<2x8x16xf32> to vector<16x16xf32>
    %214 = vector.extract_strided_slice %3 {offsets = [1, 0, 0], sizes = [1, 16, 32], strides = [1, 1, 1]} : vector<2x32x32xf32> to vector<1x16x32xf32>
    %215 = vector.shape_cast %214 : vector<1x16x32xf32> to vector<16x32xf32>
    %cst_64 = arith.constant dense<0.000000e+00> : vector<16x32xf32>
    %216 = tpu.matmul %213, %215, %cst_64 {dimension_numbers = #tpu.dot_dimension_numbers<[1], [0], [0], [1], [0, 0, 1, 1], [], []>} : vector<16x16xf32>, vector<16x32xf32>, vector<16x32xf32> -> vector<16x32xf32>
    %217 = arith.addf %192, %216 : vector<16x32xf32>
    %218 = vector.extract_strided_slice %191 {offsets = [0, 16], sizes = [16, 16], strides = [1, 1]} : vector<16x96xf32> to vector<16x16xf32>
    %219 = vector.shape_cast %218 : vector<16x16xf32> to vector<2x8x16xf32>
    %220 = vector.extract_strided_slice %191 {offsets = [0, 48], sizes = [16, 16], strides = [1, 1]} : vector<16x96xf32> to vector<16x16xf32>
    %221 = vector.shape_cast %220 : vector<16x16xf32> to vector<2x8x16xf32>
    %222 = vector.extract_strided_slice %191 {offsets = [0, 80], sizes = [16, 16], strides = [1, 1]} : vector<16x96xf32> to vector<16x16xf32>
    %223 = vector.shape_cast %222 : vector<16x16xf32> to vector<2x8x16xf32>
    "tpu.trace_start"() <{level = 10 : i32, message = "bqd,bkd->bqk"}> : () -> ()
    %cst_65 = arith.constant dense<0.000000e+00> : vector<2x8x8xf32>
    %224 = tpu.matmul %219, %221, %cst_65 {dimension_numbers = #tpu.dot_dimension_numbers<[2], [2], [1], [1], [0, 0, 0, 1, 1, 1], [0], [0]>} : vector<2x8x16xf32>, vector<2x8x16xf32>, vector<2x8x8xf32> -> vector<2x8x8xf32>
    "tpu.trace_stop"() : () -> ()
    %cst_66 = arith.constant 2.500000e-01 : f32
    %225 = vector.broadcast %cst_66 : f32 to vector<2x8x8xf32>
    %226 = arith.mulf %224, %225 : vector<2x8x8xf32>
    %cst_67 = arith.constant dense<0xFF800000> : vector<2x8xf32>
    %227 = vector.multi_reduction <maximumf>, %226, %cst_67 [2] : vector<2x8x8xf32> to vector<2x8xf32>
    %228 = vector.shape_cast %227 : vector<2x8xf32> to vector<2x8x1xf32>
    %229 = vector.broadcast %228 : vector<2x8x1xf32> to vector<2x8x8xf32>
    %230 = arith.subf %226, %229 : vector<2x8x8xf32>
    %231 = math.exp %230 : vector<2x8x8xf32>
    %cst_68 = arith.constant dense<0.000000e+00> : vector<2x8xf32>
    %232 = vector.multi_reduction <add>, %231, %cst_68 [2] : vector<2x8x8xf32> to vector<2x8xf32>
    %233 = vector.shape_cast %232 : vector<2x8xf32> to vector<2x8x1xf32>
    %234 = tpu.reciprocal %233 {approx = true} : vector<2x8x1xf32> -> vector<2x8x1xf32>
    %235 = vector.broadcast %234 : vector<2x8x1xf32> to vector<2x8x8xf32>
    %236 = arith.mulf %231, %235 : vector<2x8x8xf32>
    "tpu.trace_start"() <{level = 10 : i32, message = "bqk,bkd->bqd"}> : () -> ()
    %cst_69 = arith.constant dense<0.000000e+00> : vector<2x8x16xf32>
    %237 = tpu.matmul %236, %223, %cst_69 {dimension_numbers = #tpu.dot_dimension_numbers<[2], [1], [1], [2], [0, 0, 0, 1, 1, 2], [0], [0]>} : vector<2x8x8xf32>, vector<2x8x16xf32>, vector<2x8x16xf32> -> vector<2x8x16xf32>
    "tpu.trace_stop"() : () -> ()
    %238 = vector.shape_cast %237 : vector<2x8x16xf32> to vector<16x16xf32>
    %239 = vector.extract_strided_slice %3 {offsets = [1, 16, 0], sizes = [1, 16, 32], strides = [1, 1, 1]} : vector<2x32x32xf32> to vector<1x16x32xf32>
    %240 = vector.shape_cast %239 : vector<1x16x32xf32> to vector<16x32xf32>
    %cst_70 = arith.constant dense<0.000000e+00> : vector<16x32xf32>
    %241 = tpu.matmul %238, %240, %cst_70 {dimension_numbers = #tpu.dot_dimension_numbers<[1], [0], [0], [1], [0, 0, 1, 1], [], []>} : vector<16x16xf32>, vector<16x32xf32>, vector<16x32xf32> -> vector<16x32xf32>
    %242 = arith.addf %217, %241 : vector<16x32xf32>
    %243 = arith.addf %150, %242 : vector<16x32xf32>
    %244 = vector.shape_cast %160 : vector<32xf32> to vector<1x32xf32>
    %245 = vector.broadcast %244 : vector<1x32xf32> to vector<16x32xf32>
    %246 = arith.addf %243, %245 : vector<16x32xf32>
    %cst_71 = arith.constant dense<0.000000e+00> : vector<16xf32>
    %247 = vector.multi_reduction <add>, %246, %cst_71 [1] : vector<16x32xf32> to vector<16xf32>
    %248 = vector.shape_cast %247 : vector<16xf32> to vector<16x1xf32>
    %cst_72 = arith.constant 3.200000e+01 : f32
    %249 = vector.broadcast %cst_72 : f32 to vector<16x1xf32>
    %250 = arith.divf %248, %249 : vector<16x1xf32>
    %251 = vector.broadcast %250 : vector<16x1xf32> to vector<16x32xf32>
    %252 = arith.subf %246, %251 : vector<16x32xf32>
    %253 = vector.broadcast %250 : vector<16x1xf32> to vector<16x32xf32>
    %254 = arith.subf %246, %253 : vector<16x32xf32>
    %255 = arith.mulf %252, %254 : vector<16x32xf32>
    %cst_73 = arith.constant dense<0.000000e+00> : vector<16xf32>
    %256 = vector.multi_reduction <add>, %255, %cst_73 [1] : vector<16x32xf32> to vector<16xf32>
    %257 = vector.shape_cast %256 : vector<16xf32> to vector<16x1xf32>
    %cst_74 = arith.constant 3.200000e+01 : f32
    %258 = vector.broadcast %cst_74 : f32 to vector<16x1xf32>
    %259 = arith.divf %257, %258 : vector<16x1xf32>
    %260 = vector.broadcast %250 : vector<16x1xf32> to vector<16x32xf32>
    %261 = arith.subf %246, %260 : vector<16x32xf32>
    %cst_75 = arith.constant 9.99999974E-6 : f32
    %262 = vector.broadcast %cst_75 : f32 to vector<16x1xf32>
    %263 = arith.addf %259, %262 : vector<16x1xf32>
    %264 = math.rsqrt %263 : vector<16x1xf32>
    %265 = vector.broadcast %264 : vector<16x1xf32> to vector<16x32xf32>
    %266 = arith.mulf %261, %265 : vector<16x32xf32>
    %267 = vector.shape_cast %156 : vector<32xf32> to vector<1x32xf32>
    %268 = vector.broadcast %267 : vector<1x32xf32> to vector<16x32xf32>
    %269 = arith.mulf %266, %268 : vector<16x32xf32>
    %270 = vector.shape_cast %158 : vector<32xf32> to vector<1x32xf32>
    %271 = vector.broadcast %270 : vector<1x32xf32> to vector<16x32xf32>
    %272 = arith.addf %269, %271 : vector<16x32xf32>
    %273 = vector.extract_strided_slice %5 {offsets = [1, 0, 0], sizes = [1, 32, 128], strides = [1, 1, 1]} : vector<2x32x128xf32> to vector<1x32x128xf32>
    %274 = vector.shape_cast %273 : vector<1x32x128xf32> to vector<32x128xf32>
    %cst_76 = arith.constant dense<0.000000e+00> : vector<16x128xf32>
    %275 = tpu.matmul %272, %274, %cst_76 {dimension_numbers = #tpu.dot_dimension_numbers<[1], [0], [0], [1], [0, 0, 1, 1], [], []>} : vector<16x32xf32>, vector<32x128xf32>, vector<16x128xf32> -> vector<16x128xf32>
    %276 = vector.extract_strided_slice %6 {offsets = [1, 0, 0], sizes = [1, 1, 128], strides = [1, 1, 1]} : vector<2x1x128xf32> to vector<1x1x128xf32>
    %277 = vector.shape_cast %276 : vector<1x1x128xf32> to vector<128xf32>
    %278 = vector.shape_cast %277 : vector<128xf32> to vector<1x128xf32>
    %279 = vector.broadcast %278 : vector<1x128xf32> to vector<16x128xf32>
    %280 = arith.addf %275, %279 : vector<16x128xf32>
    %cst_77 = arith.constant 0.000000e+00 : f32
    %281 = vector.broadcast %cst_77 : f32 to vector<16x128xf32>
    %282 = arith.maximumf %280, %281 : vector<16x128xf32>
    %283 = vector.extract_strided_slice %7 {offsets = [1, 0, 0], sizes = [1, 128, 32], strides = [1, 1, 1]} : vector<2x128x32xf32> to vector<1x128x32xf32>
    %284 = vector.shape_cast %283 : vector<1x128x32xf32> to vector<128x32xf32>
    %cst_78 = arith.constant dense<0.000000e+00> : vector<16x32xf32>
    %285 = tpu.matmul %282, %284, %cst_78 {dimension_numbers = #tpu.dot_dimension_numbers<[1], [0], [0], [1], [0, 0, 1, 1], [], []>} : vector<16x128xf32>, vector<128x32xf32>, vector<16x32xf32> -> vector<16x32xf32>
    %286 = vector.shape_cast %162 : vector<32xf32> to vector<1x32xf32>
    %287 = vector.broadcast %286 : vector<1x32xf32> to vector<16x32xf32>
    %288 = arith.addf %285, %287 : vector<16x32xf32>
    %289 = arith.addf %246, %288 : vector<16x32xf32>
    %290 = vector.extract_strided_slice %8 {offsets = [0, 0], sizes = [1, 32], strides = [1, 1]} : vector<2x32xf32> to vector<1x32xf32>
    %291 = vector.shape_cast %290 : vector<1x32xf32> to vector<32xf32>
    %292 = vector.extract_strided_slice %8 {offsets = [1, 0], sizes = [1, 32], strides = [1, 1]} : vector<2x32xf32> to vector<1x32xf32>
    %293 = vector.shape_cast %292 : vector<1x32xf32> to vector<32xf32>
    %cst_79 = arith.constant dense<0.000000e+00> : vector<16xf32>
    %294 = vector.multi_reduction <add>, %289, %cst_79 [1] : vector<16x32xf32> to vector<16xf32>
    %295 = vector.shape_cast %294 : vector<16xf32> to vector<16x1xf32>
    %cst_80 = arith.constant 3.200000e+01 : f32
    %296 = vector.broadcast %cst_80 : f32 to vector<16x1xf32>
    %297 = arith.divf %295, %296 : vector<16x1xf32>
    %298 = vector.broadcast %297 : vector<16x1xf32> to vector<16x32xf32>
    %299 = arith.subf %289, %298 : vector<16x32xf32>
    %300 = vector.broadcast %297 : vector<16x1xf32> to vector<16x32xf32>
    %301 = arith.subf %289, %300 : vector<16x32xf32>
    %302 = arith.mulf %299, %301 : vector<16x32xf32>
    %cst_81 = arith.constant dense<0.000000e+00> : vector<16xf32>
    %303 = vector.multi_reduction <add>, %302, %cst_81 [1] : vector<16x32xf32> to vector<16xf32>
    %304 = vector.shape_cast %303 : vector<16xf32> to vector<16x1xf32>
    %cst_82 = arith.constant 3.200000e+01 : f32
    %305 = vector.broadcast %cst_82 : f32 to vector<16x1xf32>
    %306 = arith.divf %304, %305 : vector<16x1xf32>
    %307 = vector.broadcast %297 : vector<16x1xf32> to vector<16x32xf32>
    %308 = arith.subf %289, %307 : vector<16x32xf32>
    %cst_83 = arith.constant 9.99999974E-6 : f32
    %309 = vector.broadcast %cst_83 : f32 to vector<16x1xf32>
    %310 = arith.addf %306, %309 : vector<16x1xf32>
    %311 = math.rsqrt %310 : vector<16x1xf32>
    %312 = vector.broadcast %311 : vector<16x1xf32> to vector<16x32xf32>
    %313 = arith.mulf %308, %312 : vector<16x32xf32>
    %314 = vector.shape_cast %291 : vector<32xf32> to vector<1x32xf32>
    %315 = vector.broadcast %314 : vector<1x32xf32> to vector<16x32xf32>
    %316 = arith.mulf %313, %315 : vector<16x32xf32>
    %317 = vector.shape_cast %293 : vector<32xf32> to vector<1x32xf32>
    %318 = vector.broadcast %317 : vector<1x32xf32> to vector<16x32xf32>
    %319 = arith.addf %316, %318 : vector<16x32xf32>
    %cst_84 = arith.constant dense<0.000000e+00> : vector<16x128xf32>
    %320 = tpu.matmul %319, %9, %cst_84 {dimension_numbers = #tpu.dot_dimension_numbers<[1], [0], [0], [1], [0, 0, 1, 1], [], []>} : vector<16x32xf32>, vector<32x128xf32>, vector<16x128xf32> -> vector<16x128xf32>
    %321 = vector.shape_cast %11 : vector<128xf32> to vector<1x128xf32>
    %322 = vector.broadcast %321 : vector<1x128xf32> to vector<16x128xf32>
    %323 = arith.addf %320, %322 : vector<16x128xf32>
    %324 = vector.shape_cast %323 : vector<16x128xf32> to vector<2x8x128xf32>
    %c0_85 = arith.constant 0 : index
    %c0_86 = arith.constant 0 : index
    %c0_87 = arith.constant 0 : index
    %325 = vector.load %arg11[%c0_85, %c0_86, %c0_87] : memref<2x8x128xf32, #tpu.memory_space<vmem>>, vector<2x8x128xf32>
    tpu.vector_store %arg11[%c0_85, %c0_86, %c0_87], %324 {strides = array<i32>} : memref<2x8x128xf32, #tpu.memory_space<vmem>>, vector<2x8x128xf32>,
    return
  }
  func.func @transform_0(%arg0: i32) -> (i32, i32, i32) {
    %c0_i32 = arith.constant 0 : i32
    %c0_i32_0 = arith.constant 0 : i32
    %c0_i32_1 = arith.constant 0 : i32
    return %arg0, %c0_i32, %c0_i32_0 : i32, i32, i32
  }
  func.func @transform_1(%arg0: i32) -> (i32, i32, i32) {
    %c0_i32 = arith.constant 0 : i32
    %c0_i32_0 = arith.constant 0 : i32
    %c0_i32_1 = arith.constant 0 : i32
    %c0_i32_2 = arith.constant 0 : i32
    return %c0_i32, %c0_i32_0, %c0_i32_1 : i32, i32, i32
  }
  func.func @transform_2(%arg0: i32) -> (i32, i32, i32) {
    %c0_i32 = arith.constant 0 : i32
    %c0_i32_0 = arith.constant 0 : i32
    %c0_i32_1 = arith.constant 0 : i32
    %c0_i32_2 = arith.constant 0 : i32
    return %c0_i32, %c0_i32_0, %c0_i32_1 : i32, i32, i32
  }
  func.func @transform_3(%arg0: i32) -> (i32, i32, i32) {
    %c0_i32 = arith.constant 0 : i32
    %c0_i32_0 = arith.constant 0 : i32
    %c0_i32_1 = arith.constant 0 : i32
    %c0_i32_2 = arith.constant 0 : i32
    return %c0_i32, %c0_i32_0, %c0_i32_1 : i32, i32, i32
  }
  func.func @transform_4(%arg0: i32) -> (i32, i32, i32) {
    %c0_i32 = arith.constant 0 : i32
    %c0_i32_0 = arith.constant 0 : i32
    %c0_i32_1 = arith.constant 0 : i32
    %c0_i32_2 = arith.constant 0 : i32
    return %c0_i32, %c0_i32_0, %c0_i32_1 : i32, i32, i32
  }
  func.func @transform_5(%arg0: i32) -> (i32, i32, i32) {
    %c0_i32 = arith.constant 0 : i32
    %c0_i32_0 = arith.constant 0 : i32
    %c0_i32_1 = arith.constant 0 : i32
    %c0_i32_2 = arith.constant 0 : i32
    return %c0_i32, %c0_i32_0, %c0_i32_1 : i32, i32, i32
  }
  func.func @transform_6(%arg0: i32) -> (i32, i32, i32) {
    %c0_i32 = arith.constant 0 : i32
    %c0_i32_0 = arith.constant 0 : i32
    %c0_i32_1 = arith.constant 0 : i32
    %c0_i32_2 = arith.constant 0 : i32
    return %c0_i32, %c0_i32_0, %c0_i32_1 : i32, i32, i32
  }
  func.func @transform_7(%arg0: i32) -> (i32, i32) {
    %c0_i32 = arith.constant 0 : i32
    %c0_i32_0 = arith.constant 0 : i32
    %c0_i32_1 = arith.constant 0 : i32
    return %c0_i32, %c0_i32_0 : i32, i32
  }
  func.func @transform_8(%arg0: i32) -> (i32, i32) {
    %c0_i32 = arith.constant 0 : i32
    %c0_i32_0 = arith.constant 0 : i32
    %c0_i32_1 = arith.constant 0 : i32
    return %c0_i32, %c0_i32_0 : i32, i32
  }
  func.func @transform_9(%arg0: i32) -> (i32, i32) {
    %c0_i32 = arith.constant 0 : i32
    %c0_i32_0 = arith.constant 0 : i32
    %c0_i32_1 = arith.constant 0 : i32
    return %c0_i32, %c0_i32_0 : i32, i32
  }
  func.func @transform_10(%arg0: i32) -> (i32, i32, i32) {
    %c0_i32 = arith.constant 0 : i32
    %c0_i32_0 = arith.constant 0 : i32
    %c0_i32_1 = arith.constant 0 : i32
    return %arg0, %c0_i32, %c0_i32_0 : i32, i32, i32
  }
}

</mosaic_0001>

<bundles_post_ra>
// kernel: gpt_forward.1
= control target key start
LH: loop header
LB: loop body
LE: loop exit
PB: predicated region body
PF: predicated region fallthrough
CT: control target
= control target key end

     0   :  { %vm104_vm0 = vcmask 261120   ;;  %s1870_s0 = inlined_call_operand.vmem [shape: f32[2,8,32], index: 0, kind: input, shape index: {}]   ;;  %s1871_s1 = inlined_call_operand.vmem [shape: f32[2,32,96], index: 1, kind: input, shape index: {}]   ;;  %s1872_s2 = inlined_call_operand.vmem [shape: f32[2,32,32], index: 2, kind: input, shape index: {}]   ;;  %s1873_s3 = inlined_call_operand.vmem [shape: f32[2,6,32], index: 3, kind: input, shape index: {}]   ;;  %s1874_s4 = inlined_call_operand.vmem [shape: f32[2,32,128], index: 4, kind: input, shape index: {}]   ;;  %s1875_s5 = inlined_call_operand.vmem [shape: f32[2,1,128], index: 5, kind: input, shape index: {}]   ;;  %s1876_s6 = inlined_call_operand.vmem [shape: f32[2,128,32], index: 6, kind: input, shape index: {}]   ;;  %s1877_s7 = inlined_call_operand.vmem [shape: f32[2,32], index: 7, kind: input, shape index: {}]   ;;  %s1878_s8 = inlined_call_operand.vmem [shape: f32[32,128], index: 8, kind: input, shape index: {}]   ;;  %s1879_s9 = inlined_call_operand.vmem [shape: f32[1,128], index: 9, kind: input, shape index: {}]   ;;  %s1880_s10 = inlined_call_operand.hbm [shape: f32[2,8,128], index: 10, kind: output, shape index: {}]  }
   0x1   :  { %v1445_v0 = vld [vmem:[%s1870_s0] sm:$0xff] }
   0x2   :  { %v105_v1 = vsel %vm104_vm0, %v1445_v0, 0.0 }
   0x3   :  { %106 = vadd.xlane.f32.xlu0 %v105_v1 }
   0x4   :  { %15 = vsyncpa [#allocation3], 0  ;;  %v1378_v2 = vmov 32.0   ;;  %v1452_v3 = vld [vmem:[%s1870_s0 + $0x8] sm:$0xff]  ;;  %v41_v16 = vld [vmem:[%s1871_s1 + $0x18] sm:$0xff]  ;;  %s1379_s26 = smov 96  }
   0x5   :  { %1298 = vrcp.f32 %v1378_v2  ;;  %v108_v4 = vsel %vm104_vm0, %v1452_v3, 0.0  ;;  %180 = vmatpush.msra.mxu0 %v41_v16  ;;  %v40_v17 = vld [vmem:[%s1871_s1 + $0x10] sm:$0xff]  ;;  %v39_v18 = vld [vmem:[%s1871_s1 + $0x8] sm:$0xff]  ;;  %v38_v19 = vld [vmem:[%s1871_s1] sm:$0xff]  ;;  %s1380_s27 = smov 80   ;;  %vm194_vm8 = vcmask 130048  }
   0x6   :  { %109 = vadd.xlane.f32.xlu1 %v108_v4  ;;  %v1480_v33 = vld [vmem:[%s1873_s3] sm:$0x3f]  ;;  %vm248_vm9 = vcmask 64512   ;;  %s1381_s28 = smov 112   ;;  %s1382_s29 = smov 64  }
   0x7   :  { %181 = vmatpush.msra.mxu0 %v40_v17  ;;  %v156_v35 = vperm.slane %v1480_v33, 0  ;;  %v159_v38 = vperm.slane %v1480_v33, 1  ;;  %s1383_s14 = smov 48   ;;  %s1232_s30 = sshll.u32 %s1880_s10, 4  ;;  %s1233_s30 = int_to_ptr.hbm [resolvable:$true] %s1232_s30 }
   0x8   :  { %s1385_s11 = smov 128   ;;  %s1386_s12 = smov 8  }
   0x9   :  { %182 = vmatpush.msra.mxu0 %v39_v18 }
   0xb   :  { %v1299_v5 = vpop.eup %1298  ;;  %183 = vmatpush.msra.mxu0 %v38_v19 }
   0xc   :  { %v112_v6 = vmul.f32 32.0, %v1299_v5  ;;  %vm116_vm1 = vweird.f32 %v1299_v5 }
   0xe   :  { %v113_v7 = vsub.f32 1.0, %v112_v6 }
  0x10   :  { %v114_v8 = vmul.f32 %v1299_v5, %v113_v7 }
  0x12   :  { %v115_v9 = vadd.f32 %v1299_v5, %v114_v8 }
  0x14   :  { %v1456_v10 = vsel %vm116_vm1, %v1299_v5, %v115_v9 }
  0x76   :  { %v107_v11 = vpop.xlane.xlu0 %106 }
  0x77   :  { %v118_v12 = vmul.f32 %v1456_v10, %v107_v11 }
  0x79   :  { %v120_v13 = vsub.f32 %v1445_v0, %v118_v12  ;;  %v110_v20 = vpop.xlane.xlu1 %109 }
  0x7a   :  { %v119_v21 = vmul.f32 %v1456_v10, %v110_v20 }
  0x7b   :  { %v122_v14 = vmul.f32 %v120_v13, %v120_v13 }
  0x7c   :  { %v121_v23 = vsub.f32 %v1452_v3, %v119_v21 }
  0x7d   :  { %v124_v15 = vsel %vm104_vm0, %v122_v14, 0.0  ;;  %v47_v14 = vld [vmem:[%s1872_s2 + $0x8] sm:$0xff] }
  0x7e   :  { %125 = vadd.xlane.f32.xlu0 %v124_v15  ;;  %v123_v25 = vmul.f32 %v121_v23, %v121_v23  ;;  %504 = vmatpush.msrb.mxu0 %v47_v14  ;;  %v46_v15 = vld [vmem:[%s1872_s2] sm:$0xff] }
  0x80   :  { %v127_v27 = vsel %vm104_vm0, %v123_v25, 0.0  ;;  %505 = vmatpush.msrb.mxu0 %v46_v15 }
  0x81   :  { %128 = vadd.xlane.f32.xlu2 %v127_v27 }
  0xf1   :  { %v126_v22 = vpop.xlane.xlu0 %125 }
  0xf2   :  { %v130_v24 = vmul.f32 %v126_v22, %v1456_v10 }
  0xf4   :  { %v132_v26 = vadd.f32 1e-05, %v130_v24  ;;  %v129_v41 = vpop.xlane.xlu2 %128 }
  0xf5   :  { %v131_v42 = vmul.f32 %v129_v41, %v1456_v10 }
  0xf6   :  { %1300 = vrsqrt.f32 %v132_v26  ;;  %vm140_vm3 = vweird.f32 %v132_v26 }
  0xf7   :  { %v133_v43 = vadd.f32 1e-05, %v131_v42 }
  0xf9   :  { %1302 = vrsqrt.f32 %v133_v43  ;;  %vm150_vm5 = vweird.f32 %v133_v43 }
  0xfc   :  { %v1301_v28 = vpop.eup %1300 }
  0xfd   :  { %v135_v29 = vmul.f32 %v1301_v28, %v132_v26  ;;  %vm141_vm2 = vweird.f32 %v1301_v28 }
  0xfe   :  { %vm142_vm4 = vmor %vm140_vm3, %vm141_vm2 }
  0xff   :  { %v136_v30 = vmul.f32 %v1301_v28, %v135_v29  ;;  %v1303_v44 = vpop.eup %1302 }
 0x100   :  { %v145_v45 = vmul.f32 %v1303_v44, %v133_v43  ;;  %vm151_vm6 = vweird.f32 %v1303_v44 }
 0x101   :  { %v137_v31 = vmul.f32 0.5, %v136_v30  ;;  %vm152_vm7 = vmor %vm150_vm5, %vm151_vm6 }
 0x102   :  { %v146_v46 = vmul.f32 %v1303_v44, %v145_v45  ;;  %v49_v45 = vld [vmem:[%s1872_s2 + $0x18] sm:$0xff] }
 0x103   :  { %v138_v32 = vsub.f32 1.5, %v137_v31 }
 0x104   :  { %v147_v47 = vmul.f32 0.5, %v146_v46  ;;  %v48_v46 = vld [vmem:[%s1872_s2 + $0x10] sm:$0xff] }
 0x105   :  { %v139_v34 = vmul.f32 %v1301_v28, %v138_v32 }
 0x106   :  { %v148_v48 = vsub.f32 1.5, %v147_v47 }
 0x107   :  { %v143_v36 = vsel %vm142_vm4, %v1301_v28, %v139_v34 }
 0x108   :  { %v154_v37 = vmul.f32 %v143_v36, %v120_v13  ;;  %v149_v49 = vmul.f32 %v1303_v44, %v148_v48 }
 0x10a   :  { %v157_v39 = vmul.f32 %v156_v35, %v154_v37  ;;  %v153_v50 = vsel %vm152_vm7, %v1303_v44, %v149_v49 }
 0x10b   :  { %v155_v52 = vmul.f32 %v153_v50, %v121_v23 }
 0x10c   :  { %v160_v40 = vadd.f32 %v159_v38, %v157_v39 }
 0x10d   :  { %v158_v53 = vmul.f32 %v156_v35, %v155_v52 }
 0x10e   :  { %1244 = vmatmul.msk.f32.vlgmr.msra.gmra.mxu0 %vm104_vm0, %v160_v40 }
 0x10f   :  { %v161_v54 = vadd.f32 %v159_v38, %v158_v53 }
 0x116   :  { %1245 = vmatmul.msk.f32.gmra.mxu0 %vm104_vm0, %v161_v54 }
 0x18b   :  { %v1486_v51 = vpop.f32.mrf.mxu0 }
 0x18c   :  { %192 = vrot.lane.b32.xlu1 %v1486_v51, %s1379_s26 }
 0x193   :  { %v1497_v59 = vpop.f32.mrf.mxu0 }
 0x194   :  { %325 = vrot.lane.b32.xlu1 %v1486_v51, %s1380_s27 }
 0x1fe   :  { %v193_v55 = vpop.permute.xlu1 %192 }
 0x1ff   :  { %1246 = vmatpush.xpose.msk.msra.mxu1 %vm194_vm8, %v193_v55 }
 0x202   :  { %1247 = vmatmul.msk.f32.vlgmr.msra.gmra.mxu1 %vm194_vm8, %v1486_v51 }
 0x206   :  { %v326_v12 = vpop.permute.xlu1 %325 }
 0x27f   :  { %v216_v56 = vpop.f32.mrf.mxu1 }
 0x280   :  { %v246_v57 = vmul.f32 0.25, %v216_v56 }
 0x282   :  { %v249_v58 = vsel %vm248_vm9, %v246_v57, -inf }
 0x283   :  { %250 = vmax.xlane.f32.xlu2 %v249_v58 }
 0x29b   :  { %220 = vrot.lane.b32.xlu2 %v1497_v59, %s1379_s26 }
 0x2a3   :  { %323 = vrot.lane.b32.xlu2 %v1486_v51, %s1381_s28 }
 0x2f6   :  { %v251_v60 = vpop.xlane.xlu2 %250 }
 0x2f7   :  { %v255_v61 = vsub.f32 %v246_v57, %v251_v60  ;;  %v515_v60 = vperm.slane %v1480_v33, 4 }
 0x2f9   :  { %v257_v62 = vmul.f32 1.442695, %v255_v61 }
 0x2fb   :  { %1304 = vpow2.f32 %v257_v62 }
 0x2fe   :  { %v221_v63 = vpop.permute.xlu2 %220 }
 0x2ff   :  { %1248 = vmatpush.xpose.msk.msra.mxu2 %vm194_vm8, %v221_v63 }
 0x301   :  { %v1305_v1 = vpop.eup %1304 }
 0x302   :  { %1249 = vmatmul.msk.f32.vlgmr.msra.gmra.mxu2 %vm194_vm8, %v1497_v59  ;;  %v261_v2 = vsel %vm248_vm9, %v1305_v1, 0.0 }
 0x303   :  { %262 = vadd.xlane.f32.xlu0 %v261_v2 }
 0x306   :  { %v324_v13 = vpop.permute.xlu2 %323 }
 0x317   :  { %271 = vrot.lane.b32.xlu0 %v1486_v51, %s1382_s29 }
 0x376   :  { %v263_v4 = vpop.xlane.xlu0 %262 }
 0x377   :  { %1306 = vrcp.f32 %v263_v4 }
 0x37d   :  { %v1307_v6 = vpop.eup %1306 }
 0x37e   :  { %v269_v11 = vmul.f32 %v1307_v6, %v1305_v1 }
 0x385   :  { %v243_v5 = vpop.f32.mrf.mxu2 }
 0x386   :  { %v247_v7 = vmul.f32 0.25, %v243_v5 }
 0x388   :  { %v252_v8 = vsel %vm248_vm9, %v247_v7, -inf }
 0x389   :  { %v272_v9 = vpop.permute.xlu0 %271  ;;  %253 = vmax.xlane.f32.xlu1 %v252_v8  ;;  %v58_v8 = vld [vmem:[%s1874_s4 + $0x10] sm:$0xff] }
 0x38a   :  { %292 = vmatpush.msrb.mxu1 %v272_v9  ;;  %v57_v9 = vld [vmem:[%s1874_s4 + $0x8] sm:$0xff] }
 0x38b   :  { %1250 = vmatmul.msk.f32.vlgmr.msrb.gmra.mxu1 %vm248_vm9, %v269_v11  ;;  %v56_v11 = vld [vmem:[%s1874_s4] sm:$0xff] }
 0x38c   :  { %1252 = vmatpush.xpose.msk.msra.mxu1 %vm194_vm8, %v326_v12 }
 0x393   :  { %1253 = vmatmul.msk.f32.vlgmr.msra.gmra.mxu1 %vm194_vm8, %v324_v13 }
 0x3a2   :  { %353 = vrot.lane.b32.xlu1 %v1497_v59, %s1380_s27 }
 0x3fc   :  { %v254_v16 = vpop.xlane.xlu1 %253 }
 0x3fd   :  { %v256_v17 = vsub.f32 %v247_v7, %v254_v16 }
 0x3ff   :  { %v259_v18 = vmul.f32 1.442695, %v256_v17 }
 0x401   :  { %1308 = vpow2.f32 %v259_v18 }
 0x407   :  { %v1309_v19 = vpop.eup %1308 }
 0x408   :  { %v294_v20 = vpop.f32.mrf.mxu1  ;;  %v264_v21 = vsel %vm248_vm9, %v1309_v19, 0.0 }
 0x409   :  { %1260 = vmatmul.msk.f32.vlgmr.msrb.gmra.mxu0 %vm194_vm8, %v294_v20  ;;  %265 = vadd.xlane.f32.xlu2 %v264_v21 }
 0x410   :  { %v348_v22 = vpop.f32.mrf.mxu1 }
 0x411   :  { %v379_v23 = vmul.f32 0.25, %v348_v22 }
 0x413   :  { %v381_v24 = vsel %vm248_vm9, %v379_v23, -inf }
 0x414   :  { %v354_v25 = vpop.permute.xlu1 %353  ;;  %382 = vmax.xlane.f32.xlu0 %v381_v24 }
 0x415   :  { %1254 = vmatpush.xpose.msk.msrb.mxu2 %vm194_vm8, %v354_v25 }
 0x428   :  { %351 = vrot.lane.b32.xlu0 %v1497_v59, %s1381_s28 }
 0x430   :  { %403 = vrot.lane.b32.xlu0 %v1486_v51, %s1383_s14 }
 0x47c   :  { %v266_v32 = vpop.xlane.xlu2 %265 }
 0x486   :  { %v507_v57 = vpop.f32.mrf.mxu0 }
 0x487   :  { %v383_v26 = vpop.xlane.xlu0 %382 }
 0x488   :  { %v387_v27 = vsub.f32 %v379_v23, %v383_v26 }
 0x48a   :  { %v389_v28 = vmul.f32 1.442695, %v387_v27  ;;  %v562_v27 = vperm.slane %v1480_v33, 2 }
 0x48c   :  { %1310 = vpow2.f32 %v389_v28 }
 0x48d   :  { %1312 = vrcp.f32 %v266_v32  ;;  %v81_v32 = vld [vmem:[%s1876_s6 + $0x78] sm:$0xff] }
 0x492   :  { %v1311_v29 = vpop.eup %1310 }
 0x493   :  { %v393_v30 = vsel %vm248_vm9, %v1311_v29, 0.0  ;;  %v1313_v35 = vpop.eup %1312 }
 0x494   :  { %394 = vadd.xlane.f32.xlu2 %v393_v30  ;;  %v270_v37 = vmul.f32 %v1313_v35, %v1309_v19  ;;  %v565_v30 = vperm.slane %v1480_v33, 3  ;;  %v79_v35 = vld [vmem:[%s1876_s6 + $0x68] sm:$0xff] }
 0x49a   :  { %v352_v31 = vpop.permute.xlu0 %351 }
 0x49b   :  { %1255 = vmatmul.msk.f32.vlgmr.msrb.gmra.mxu2 %vm194_vm8, %v352_v31 }
 0x4a2   :  { %v404_v38 = vpop.permute.xlu0 %403 }
 0x4ac   :  { %297 = vrot.lane.b32.xlu2 %v1497_v59, %s1382_s29 }
 0x4b4   :  { %429 = vrot.lane.b32.xlu2 %v1497_v59, %s1383_s14 }
 0x507   :  { %v395_v34 = vpop.xlane.xlu2 %394 }
 0x508   :  { %1314 = vrcp.f32 %v395_v34  ;;  %v80_v34 = vld [vmem:[%s1876_s6 + $0x70] sm:$0xff] }
 0x50e   :  { %v1315_v39 = vpop.eup %1314 }
 0x50f   :  { %v298_v36 = vpop.permute.xlu2 %297  ;;  %v401_v41 = vmul.f32 %v1315_v39, %v1311_v29  ;;  %v75_v39 = vld [vmem:[%s1876_s6 + $0x48] sm:$0xff] }
 0x510   :  { %318 = vmatpush.msra.mxu3 %v298_v36  ;;  %v78_v36 = vld [vmem:[%s1876_s6 + $0x60] sm:$0xff] }
 0x511   :  { %1251 = vmatmul.msk.f32.vlgmr.msra.gmra.mxu3 %vm248_vm9, %v270_v37  ;;  %v77_v37 = vld [vmem:[%s1876_s6 + $0x58] sm:$0xff] }
 0x512   :  { %424 = vmatpush.msrb.mxu3 %v404_v38  ;;  %v76_v38 = vld [vmem:[%s1876_s6 + $0x50] sm:$0xff] }
 0x514   :  { %475 = vmatpush.msra.mxu3 %v49_v45  ;;  %v69_v45 = vld [vmem:[%s1876_s6 + $0x18] sm:$0xff] }
 0x516   :  { %476 = vmatpush.msra.mxu3 %v48_v46  ;;  %v68_v46 = vld [vmem:[%s1876_s6 + $0x10] sm:$0xff] }
 0x517   :  { %v430_v40 = vpop.permute.xlu2 %429 }
 0x518   :  { %450 = vmatpush.msrb.mxu1 %v430_v40  ;;  %v74_v40 = vld [vmem:[%s1876_s6 + $0x40] sm:$0xff] }
 0x519   :  { %1256 = vmatmul.msk.f32.vlgmr.msrb.gmra.mxu3 %vm248_vm9, %v401_v41  ;;  %v73_v41 = vld [vmem:[%s1876_s6 + $0x38] sm:$0xff] }
 0x51a   :  { %603 = vmatpush.msra.mxu1 %v81_v32 }
 0x51c   :  { %604 = vmatpush.msra.mxu1 %v80_v34 }
 0x51e   :  { %v376_v42 = vpop.f32.mrf.mxu2  ;;  %605 = vmatpush.msra.mxu1 %v79_v35 }
 0x51f   :  { %v380_v43 = vmul.f32 0.25, %v376_v42  ;;  %v72_v42 = vld [vmem:[%s1876_s6 + $0x30] sm:$0xff] }
 0x520   :  { %606 = vmatpush.msra.mxu1 %v78_v36 }
 0x521   :  { %v384_v44 = vsel %vm248_vm9, %v380_v43, -inf }
 0x522   :  { %385 = vmax.xlane.f32.xlu1 %v384_v44  ;;  %607 = vmatpush.msra.mxu1 %v77_v37  ;;  %v70_v44 = vld [vmem:[%s1876_s6 + $0x20] sm:$0xff]  ;;  %v1673_v37 = vld [vmem:[%s1873_s3 + $0x8] sm:$0x3f] }
 0x524   :  { %608 = vmatpush.msra.mxu1 %v76_v38 }
 0x526   :  { %609 = vmatpush.msra.mxu1 %v75_v39 }
 0x528   :  { %610 = vmatpush.msra.mxu1 %v74_v40  ;;  %v672_v40 = vperm.slane %v1673_v37, 0 }
 0x52a   :  { %611 = vmatpush.msra.mxu1 %v73_v41 }
 0x52c   :  { %612 = vmatpush.msra.mxu1 %v72_v42  ;;  %v675_v42 = vperm.slane %v1673_v37, 1 }
 0x594   :  { %v320_v47 = vpop.f32.mrf.mxu3 }
 0x595   :  { %v386_v48 = vpop.xlane.xlu1 %385  ;;  %1261 = vmatmul.msk.f32.gmra.mxu0 %vm194_vm8, %v320_v47  ;;  %v67_v47 = vld [vmem:[%s1876_s6 + $0x8] sm:$0xff] }
 0x596   :  { %v388_v49 = vsub.f32 %v380_v43, %v386_v48  ;;  %v71_v43 = vld [vmem:[%s1876_s6 + $0x28] sm:$0xff]  ;;  %v66_v48 = vld [vmem:[%s1876_s6] sm:$0xff] }
 0x597   :  { %613 = vmatpush.msra.mxu1 %v71_v43 }
 0x598   :  { %v391_v50 = vmul.f32 1.442695, %v388_v49 }
 0x599   :  { %614 = vmatpush.msra.mxu1 %v70_v44 }
 0x59a   :  { %1316 = vpow2.f32 %v391_v50 }
 0x59b   :  { %615 = vmatpush.msra.mxu1 %v69_v45 }
 0x59c   :  { %v426_v51 = vpop.f32.mrf.mxu3 }
 0x59d   :  { %1258 = vmatmul.msk.f32.vlgmr.msra.gmra.mxu3 %vm194_vm8, %v426_v51  ;;  %616 = vmatpush.msra.mxu1 %v68_v46 }
 0x59f   :  { %617 = vmatpush.msra.mxu1 %v67_v47 }
 0x5a0   :  { %v1317_v52 = vpop.eup %1316 }
 0x5a1   :  { %v396_v53 = vsel %vm248_vm9, %v1317_v52, 0.0  ;;  %618 = vmatpush.msra.mxu1 %v66_v48 }
 0x5a2   :  { %397 = vadd.xlane.f32.xlu0 %v396_v53 }
 0x612   :  { %v510_v15 = vpop.f32.mrf.mxu0 }
 0x615   :  { %v398_v54 = vpop.xlane.xlu0 %397 }
 0x616   :  { %1318 = vrcp.f32 %v398_v54  ;;  %v1295_v54 = vld [vmem:[%s1875_s5] ss:$0 sm:$0xff] }
 0x61c   :  { %v1319_v55 = vpop.eup %1318 }
 0x61d   :  { %v402_v56 = vmul.f32 %v1319_v55, %v1317_v52 }
 0x61f   :  { %1257 = vmatmul.msk.f32.vlgmr.msrb.gmra.mxu1 %vm248_vm9, %v402_v56 }
 0x620   :  { %v478_v58 = vpop.f32.mrf.mxu3 }
 0x621   :  { %v508_v59 = vadd.f32 %v507_v57, %v478_v58 }
 0x623   :  { %v513_v61 = vadd.f32 %v508_v59, %v1445_v0  ;;  %v59_v0 = vld [vmem:[%s1874_s4 + $0x18] sm:$0xff] }
 0x624   :  { %589 = vmatpush.msrb.mxu3 %v59_v0 }
 0x625   :  { %v1550_v62 = vadd.f32 %v515_v60, %v513_v61 }
 0x626   :  { %590 = vmatpush.msrb.mxu3 %v58_v8 }
 0x627   :  { %v518_v63 = vsel %vm104_vm0, %v1550_v62, 0.0 }
 0x628   :  { %519 = vadd.xlane.f32.xlu2 %v518_v63  ;;  %591 = vmatpush.msrb.mxu3 %v57_v9  ;;  %v602_v9 = vperm.slane %v1480_v33, 5 }
 0x62a   :  { %592 = vmatpush.msrb.mxu3 %v56_v11 }
 0x69b   :  { %v520_v1 = vpop.xlane.xlu2 %519 }
 0x69c   :  { %v524_v2 = vmul.f32 %v520_v1, %v1456_v10  ;;  %v452_v4 = vpop.f32.mrf.mxu1 }
 0x69d   :  { %1259 = vmatmul.msk.f32.gmra.mxu3 %vm194_vm8, %v452_v4 }
 0x69e   :  { %v526_v5 = vsub.f32 %v1550_v62, %v524_v2 }
 0x6a0   :  { %v528_v6 = vmul.f32 %v526_v5, %v526_v5 }
 0x6a2   :  { %v530_v7 = vsel %vm104_vm0, %v528_v6, 0.0 }
 0x6a3   :  { %531 = vadd.xlane.f32.xlu1 %v530_v7 }
 0x716   :  { %v532_v12 = vpop.xlane.xlu1 %531 }
 0x717   :  { %v536_v13 = vmul.f32 %v532_v12, %v1456_v10 }
 0x719   :  { %v538_v14 = vadd.f32 1e-05, %v536_v13 }
 0x71b   :  { %1320 = vrsqrt.f32 %v538_v14  ;;  %vm546_vm11 = vweird.f32 %v538_v14 }
 0x720   :  { %v481_v16 = vpop.f32.mrf.mxu3 }
 0x721   :  { %v1321_v17 = vpop.eup %1320  ;;  %v511_v18 = vadd.f32 %v510_v15, %v481_v16 }
 0x722   :  { %v541_v19 = vmul.f32 %v1321_v17, %v538_v14  ;;  %vm547_vm10 = vweird.f32 %v1321_v17 }
 0x723   :  { %v514_v20 = vadd.f32 %v511_v18, %v1452_v3  ;;  %vm548_vm12 = vmor %vm546_vm11, %vm547_vm10 }
 0x724   :  { %v542_v21 = vmul.f32 %v1321_v17, %v541_v19 }
 0x725   :  { %v1572_v22 = vadd.f32 %v515_v60, %v514_v20 }
 0x726   :  { %v543_v23 = vmul.f32 0.5, %v542_v21 }
 0x727   :  { %v521_v24 = vsel %vm104_vm0, %v1572_v22, 0.0 }
 0x728   :  { %v544_v25 = vsub.f32 1.5, %v543_v23  ;;  %522 = vadd.xlane.f32.xlu0 %v521_v24  ;;  %v44_v23 = vld [vmem:[%s1871_s1 + $0x30] sm:$0xff]  ;;  %v43_v24 = vld [vmem:[%s1871_s1 + $0x28] sm:$0xff] }
 0x72a   :  { %v545_v26 = vmul.f32 %v1321_v17, %v544_v25  ;;  %v42_v25 = vld [vmem:[%s1871_s1 + $0x20] sm:$0xff] }
 0x72c   :  { %v549_v28 = vsel %vm548_vm12, %v1321_v17, %v545_v26 }
 0x72d   :  { %v560_v29 = vmul.f32 %v549_v28, %v526_v5 }
 0x72f   :  { %v563_v3 = vmul.f32 %v562_v27, %v560_v29 }
 0x731   :  { %v566_v31 = vadd.f32 %v565_v30, %v563_v3 }
 0x733   :  { %1262 = vmatmul.msk.f32.vlgmr.msrb.gmra.mxu3 %vm104_vm0, %v566_v31 }
 0x79b   :  { %v523_v49 = vpop.xlane.xlu0 %522 }
 0x79c   :  { %v525_v50 = vmul.f32 %v523_v49, %v1456_v10 }
 0x79e   :  { %v527_v51 = vsub.f32 %v1572_v22, %v525_v50 }
 0x7a0   :  { %v529_v52 = vmul.f32 %v527_v51, %v527_v51 }
 0x7a2   :  { %v533_v53 = vsel %vm104_vm0, %v529_v52, 0.0 }
 0x7a3   :  { %534 = vadd.xlane.f32.xlu1 %v533_v53 }
 0x7b6   :  { %v594_v55 = vpop.f32.mrf.mxu3 }
 0x7b7   :  { %v595_v56 = vadd.f32 %v1295_v54, %v594_v55 }
 0x7b9   :  { %v600_v57 = vmax.f32 %v595_v56, 0.0 }
 0x7bb   :  { %619 = vmatmul.f32.vlgmr.msra.gmra.mxu1 %v600_v57 }
 0x816   :  { %v535_v58 = vpop.xlane.xlu1 %534 }
 0x817   :  { %v537_v59 = vmul.f32 %v535_v58, %v1456_v10 }
 0x819   :  { %v539_v60 = vadd.f32 1e-05, %v537_v59 }
 0x81b   :  { %1322 = vrsqrt.f32 %v539_v60  ;;  %vm556_vm14 = vweird.f32 %v539_v60 }
 0x821   :  { %v1323_v61 = vpop.eup %1322 }
 0x822   :  { %v551_v63 = vmul.f32 %v1323_v61, %v539_v60  ;;  %vm557_vm13 = vweird.f32 %v1323_v61 }
 0x823   :  { %vm558_vm15 = vmor %vm556_vm14, %vm557_vm13 }
 0x824   :  { %v552_v1 = vmul.f32 %v1323_v61, %v551_v63 }
 0x826   :  { %v553_v2 = vmul.f32 0.5, %v552_v1 }
 0x828   :  { %v554_v4 = vsub.f32 1.5, %v553_v2 }
 0x82a   :  { %v555_v5 = vmul.f32 %v1323_v61, %v554_v4 }
 0x82c   :  { %v559_v6 = vsel %vm558_vm15, %v1323_v61, %v555_v5 }
 0x82d   :  { %v561_v7 = vmul.f32 %v559_v6, %v527_v51 }
 0x82f   :  { %v564_v0 = vmul.f32 %v562_v27, %v561_v7 }
 0x831   :  { %v567_v8 = vadd.f32 %v565_v30, %v564_v0 }
 0x833   :  { %1263 = vmatmul.msk.f32.gmra.mxu3 %vm104_vm0, %v567_v8 }
 0x838   :  { %v620_v11 = vpop.f32.mrf.mxu1 }
 0x839   :  { %v621_v12 = vadd.f32 %v620_v11, %v602_v9 }
 0x83b   :  { %v1645_v13 = vadd.f32 %v621_v12, %v1550_v62  ;;  %v45_v62 = vld [vmem:[%s1871_s1 + $0x38] sm:$0xff] }
 0x83c   :  { %696 = vmatpush.msra.mxu2 %v45_v62 }
 0x83d   :  { %v628_v14 = vsel %vm104_vm0, %v1645_v13, 0.0 }
 0x83e   :  { %629 = vadd.xlane.f32.xlu0 %v628_v14  ;;  %697 = vmatpush.msra.mxu2 %v44_v23 }
 0x840   :  { %698 = vmatpush.msra.mxu2 %v43_v24 }
 0x842   :  { %699 = vmatpush.msra.mxu2 %v42_v25 }
 0x8b1   :  { %v630_v15 = vpop.xlane.xlu0 %629 }
 0x8b2   :  { %v634_v16 = vmul.f32 %v630_v15, %v1456_v10 }
 0x8b4   :  { %v636_v17 = vsub.f32 %v1645_v13, %v634_v16 }
 0x8b6   :  { %v597_v18 = vpop.f32.mrf.mxu3  ;;  %v638_v19 = vmul.f32 %v636_v17, %v636_v17 }
 0x8b7   :  { %v598_v20 = vadd.f32 %v1295_v54, %v597_v18 }
 0x8b8   :  { %v640_v21 = vsel %vm104_vm0, %v638_v19, 0.0 }
 0x8b9   :  { %v601_v33 = vmax.f32 %v598_v20, 0.0  ;;  %641 = vadd.xlane.f32.xlu1 %v640_v21 }
 0x8bb   :  { %622 = vmatmul.f32.gmra.mxu1 %v601_v33 }
 0x92c   :  { %v642_v26 = vpop.xlane.xlu1 %641 }
 0x92d   :  { %v646_v27 = vmul.f32 %v642_v26, %v1456_v10 }
 0x92f   :  { %v648_v28 = vadd.f32 1e-05, %v646_v27 }
 0x931   :  { %1324 = vrsqrt.f32 %v648_v28  ;;  %vm656_vm2 = vweird.f32 %v648_v28 }
 0x937   :  { %v1325_v29 = vpop.eup %1324 }
 0x938   :  { %v651_v30 = vmul.f32 %v1325_v29, %v648_v28  ;;  %v623_v3 = vpop.f32.mrf.mxu1  ;;  %vm657_vm1 = vweird.f32 %v1325_v29 }
 0x939   :  { %v624_v31 = vadd.f32 %v623_v3, %v602_v9  ;;  %vm658_vm3 = vmor %vm656_vm2, %vm657_vm1 }
 0x93a   :  { %v652_v32 = vmul.f32 %v1325_v29, %v651_v30 }
 0x93b   :  { %v1666_v34 = vadd.f32 %v624_v31, %v1572_v22 }
 0x93c   :  { %v653_v35 = vmul.f32 0.5, %v652_v32 }
 0x93d   :  { %v631_v36 = vsel %vm104_vm0, %v1666_v34, 0.0 }
 0x93e   :  { %v654_v38 = vsub.f32 1.5, %v653_v35  ;;  %632 = vadd.xlane.f32.xlu2 %v631_v36 }
 0x940   :  { %v655_v39 = vmul.f32 %v1325_v29, %v654_v38 }
 0x942   :  { %v659_v41 = vsel %vm658_vm3, %v1325_v29, %v655_v39 }
 0x943   :  { %v670_v22 = vmul.f32 %v659_v41, %v636_v17 }
 0x945   :  { %v673_v43 = vmul.f32 %v672_v40, %v670_v22 }
 0x947   :  { %v676_v44 = vadd.f32 %v675_v42, %v673_v43 }
 0x949   :  { %1264 = vmatmul.msk.f32.vlgmr.msra.gmra.mxu2 %vm104_vm0, %v676_v44 }
 0x9b1   :  { %v633_v45 = vpop.xlane.xlu2 %632 }
 0x9b2   :  { %v635_v46 = vmul.f32 %v633_v45, %v1456_v10 }
 0x9b4   :  { %v637_v47 = vsub.f32 %v1666_v34, %v635_v46 }
 0x9b6   :  { %v639_v48 = vmul.f32 %v637_v47, %v637_v47 }
 0x9b8   :  { %v643_v49 = vsel %vm104_vm0, %v639_v48, 0.0 }
 0x9b9   :  { %644 = vadd.xlane.f32.xlu1 %v643_v49 }
 0x9cc   :  { %v1681_v50 = vpop.f32.mrf.mxu2 }
 0x9cd   :  { %708 = vrot.lane.b32.xlu0 %v1681_v50, %s1379_s26 }
 0x9d5   :  { %839 = vrot.lane.b32.xlu0 %v1681_v50, %s1380_s27 }
 0x9dd   :  { %785 = vrot.lane.b32.xlu0 %v1681_v50, %s1382_s29 }
 0xa2c   :  { %v645_v51 = vpop.xlane.xlu1 %644 }
 0xa2d   :  { %v647_v52 = vmul.f32 %v645_v51, %v1456_v10 }
 0xa2f   :  { %v649_v53 = vadd.f32 1e-05, %v647_v52 }
 0xa31   :  { %1326 = vrsqrt.f32 %v649_v53  ;;  %vm666_vm5 = vweird.f32 %v649_v53 }
 0xa37   :  { %v1327_v54 = vpop.eup %1326 }
 0xa38   :  { %v661_v55 = vmul.f32 %v1327_v54, %v649_v53  ;;  %vm667_vm4 = vweird.f32 %v1327_v54  ;;  %v53_v53 = vld [vmem:[%s1872_s2 + $0x38] sm:$0xff] }
 0xa39   :  { %vm668_vm6 = vmor %vm666_vm5, %vm667_vm4 }
 0xa3a   :  { %v662_v56 = vmul.f32 %v1327_v54, %v661_v55 }
 0xa3c   :  { %v663_v57 = vmul.f32 0.5, %v662_v56 }
 0xa3e   :  { %v664_v58 = vsub.f32 1.5, %v663_v57 }
 0xa3f   :  { %v709_v59 = vpop.permute.xlu0 %708 }
 0xa40   :  { %v665_v60 = vmul.f32 %v1327_v54, %v664_v58  ;;  %1266 = vmatpush.xpose.msk.msra.mxu0 %vm194_vm8, %v709_v59  ;;  %v51_v59 = vld [vmem:[%s1872_s2 + $0x28] sm:$0xff] }
 0xa42   :  { %v669_v61 = vsel %vm668_vm6, %v1327_v54, %v665_v60 }
 0xa43   :  { %1267 = vmatmul.msk.f32.vlgmr.msra.gmra.mxu0 %vm194_vm8, %v1681_v50  ;;  %v671_v63 = vmul.f32 %v669_v61, %v637_v47 }
 0xa45   :  { %v674_v1 = vmul.f32 %v672_v40, %v671_v63 }
 0xa47   :  { %v840_v2 = vpop.permute.xlu0 %839  ;;  %v677_v4 = vadd.f32 %v675_v42, %v674_v1 }
 0xa48   :  { %1272 = vmatpush.xpose.msk.msrb.mxu2 %vm194_vm8, %v840_v2  ;;  %v52_v2 = vld [vmem:[%s1872_s2 + $0x30] sm:$0xff] }
 0xa49   :  { %1265 = vmatmul.msk.f32.gmra.mxu2 %vm104_vm0, %v677_v4 }
 0xa4f   :  { %v786_v5 = vpop.permute.xlu0 %785 }
 0xa50   :  { %806 = vmatpush.msrb.mxu0 %v786_v5 }
 0xac0   :  { %v731_v6 = vpop.f32.mrf.mxu0 }
 0xac1   :  { %v761_v7 = vmul.f32 0.25, %v731_v6 }
 0xac3   :  { %v763_v0 = vsel %vm248_vm9, %v761_v7, -inf }
 0xac4   :  { %764 = vmax.xlane.f32.xlu2 %v763_v0 }
 0xacc   :  { %v1696_v8 = vpop.f32.mrf.mxu2 }
 0xacd   :  { %865 = vrot.lane.b32.xlu0 %v1696_v8, %s1381_s28  ;;  %735 = vrot.lane.b32.xlu1 %v1696_v8, %s1379_s26 }
 0xad5   :  { %867 = vrot.lane.b32.xlu1 %v1696_v8, %s1380_s27 }
 0xb37   :  { %v765_v9 = vpop.xlane.xlu2 %764 }
 0xb38   :  { %v769_v11 = vsub.f32 %v761_v7, %v765_v9 }
 0xb3a   :  { %v771_v12 = vmul.f32 1.442695, %v769_v11 }
 0xb3c   :  { %1328 = vpow2.f32 %v771_v12 }
 0xb3f   :  { %v736_v14 = vpop.permute.xlu1 %735  ;;  %v866_v23 = vpop.permute.xlu0 %865 }
 0xb40   :  { %1268 = vmatpush.xpose.msk.msra.mxu3 %vm194_vm8, %v736_v14 }
 0xb42   :  { %v1329_v15 = vpop.eup %1328 }
 0xb43   :  { %1269 = vmatmul.msk.f32.vlgmr.msra.gmra.mxu3 %vm194_vm8, %v1696_v8  ;;  %v775_v16 = vsel %vm248_vm9, %v1329_v15, 0.0 }
 0xb44   :  { %776 = vadd.xlane.f32.xlu2 %v775_v16 }
 0xb47   :  { %v868_v17 = vpop.permute.xlu1 %867 }
 0xb48   :  { %1274 = vmatpush.xpose.msk.msra.mxu0 %vm194_vm8, %v868_v17 }
 0xb5c   :  { %837 = vrot.lane.b32.xlu2 %v1681_v50, %s1381_s28 }
 0xbb7   :  { %v777_v18 = vpop.xlane.xlu2 %776 }
 0xbb8   :  { %1330 = vrcp.f32 %v777_v18 }
 0xbbe   :  { %v1331_v19 = vpop.eup %1330 }
 0xbbf   :  { %v783_v20 = vmul.f32 %v1331_v19, %v1329_v15  ;;  %v838_v21 = vpop.permute.xlu2 %837 }
 0xbc0   :  { %1273 = vmatmul.msk.f32.vlgmr.msrb.gmra.mxu2 %vm194_vm8, %v838_v21 }
 0xbc1   :  { %1270 = vmatmul.msk.f32.vlgmr.msrb.gmra.mxu0 %vm248_vm9, %v783_v20 }
 0xbc2   :  { %989 = vmatpush.msrb.mxu0 %v53_v53  ;;  %v89_v53 = vld [vmem:[%s1876_s6 + $0xb8] sm:$0xff] }
 0xbc4   :  { %990 = vmatpush.msrb.mxu0 %v52_v2  ;;  %v86_v2 = vld [vmem:[%s1876_s6 + $0xa0] sm:$0xff] }
 0xbc6   :  { %v758_v33 = vpop.f32.mrf.mxu3 }
 0xbc7   :  { %v762_v62 = vmul.f32 0.25, %v758_v33 }
 0xbc9   :  { %1275 = vmatmul.msk.f32.vlgmr.msra.gmra.mxu0 %vm194_vm8, %v866_v23  ;;  %v766_v24 = vsel %vm248_vm9, %v762_v62, -inf }
 0xbca   :  { %767 = vmax.xlane.f32.xlu1 %v766_v24 }
 0xc3d   :  { %v768_v25 = vpop.xlane.xlu1 %767 }
 0xc3e   :  { %v770_v26 = vsub.f32 %v762_v62, %v768_v25  ;;  %v808_v27 = vpop.f32.mrf.mxu0 }
 0xc40   :  { %v773_v28 = vmul.f32 1.442695, %v770_v26 }
 0xc42   :  { %1332 = vpow2.f32 %v773_v28  ;;  %v62_v28 = vld [vmem:[%s1874_s4 + $0x30] sm:$0xff] }
 0xc43   :  { %v862_v29 = vpop.f32.mrf.mxu2 }
 0xc44   :  { %v893_v30 = vmul.f32 0.25, %v862_v29  ;;  %v61_v29 = vld [vmem:[%s1874_s4 + $0x28] sm:$0xff] }
 0xc46   :  { %v890_v3 = vpop.f32.mrf.mxu0  ;;  %v895_v31 = vsel %vm248_vm9, %v893_v30, -inf }
 0xc47   :  { %v894_v32 = vmul.f32 0.25, %v890_v3  ;;  %896 = vmax.xlane.f32.xlu0 %v895_v31 }
 0xc48   :  { %v1333_v35 = vpop.eup %1332 }
 0xc49   :  { %v898_v36 = vsel %vm248_vm9, %v894_v32, -inf  ;;  %v778_v38 = vsel %vm248_vm9, %v1333_v35, 0.0 }
 0xc4a   :  { %899 = vmax.xlane.f32.xlu2 %v898_v36  ;;  %779 = vadd.xlane.f32.xlu1 %v778_v38  ;;  %v96_v36 = vld [vmem:[%s1876_s6 + $0xf0] sm:$0xff]  ;;  %v95_v38 = vld [vmem:[%s1876_s6 + $0xe8] sm:$0xff] }
 0xc62   :  { %811 = vrot.lane.b32.xlu2 %v1696_v8, %s1382_s29 }
 0xcba   :  { %v897_v39 = vpop.xlane.xlu0 %896 }
 0xcbb   :  { %v901_v40 = vsub.f32 %v893_v30, %v897_v39  ;;  %v60_v30 = vld [vmem:[%s1874_s4 + $0x20] sm:$0xff] }
 0xcbd   :  { %v903_v41 = vmul.f32 1.442695, %v901_v40  ;;  %v900_v22 = vpop.xlane.xlu2 %899  ;;  %v780_v42 = vpop.xlane.xlu1 %779 }
 0xcbe   :  { %v902_v43 = vsub.f32 %v894_v32, %v900_v22  ;;  %1334 = vrcp.f32 %v780_v42 }
 0xcbf   :  { %1336 = vpow2.f32 %v903_v41  ;;  %v94_v41 = vld [vmem:[%s1876_s6 + $0xe0] sm:$0xff] }
 0xcc0   :  { %v905_v44 = vmul.f32 1.442695, %v902_v43  ;;  %v93_v43 = vld [vmem:[%s1876_s6 + $0xd8] sm:$0xff] }
 0xcc2   :  { %1338 = vpow2.f32 %v905_v44 }
 0xcc4   :  { %v1335_v45 = vpop.eup %1334 }
 0xcc5   :  { %v1337_v46 = vpop.eup %1336  ;;  %v784_v47 = vmul.f32 %v1335_v45, %v1333_v35  ;;  %v812_v48 = vpop.permute.xlu2 %811  ;;  %v97_v35 = vld [vmem:[%s1876_s6 + $0xf8] sm:$0xff]  ;;  %v92_v45 = vld [vmem:[%s1876_s6 + $0xd0] sm:$0xff] }
 0xcc6   :  { %832 = vmatpush.msrb.mxu3 %v812_v48  ;;  %v907_v49 = vsel %vm248_vm9, %v1337_v46, 0.0 }
 0xcc7   :  { %1271 = vmatmul.msk.f32.vlgmr.msrb.gmra.mxu3 %vm248_vm9, %v784_v47  ;;  %908 = vadd.xlane.f32.xlu0 %v907_v49  ;;  %v91_v47 = vld [vmem:[%s1876_s6 + $0xc8] sm:$0xff]  ;;  %v90_v49 = vld [vmem:[%s1876_s6 + $0xc0] sm:$0xff] }
 0xcc8   :  { %v1339_v51 = vpop.eup %1338 }
 0xcc9   :  { %v910_v52 = vsel %vm248_vm9, %v1339_v51, 0.0 }
 0xcca   :  { %911 = vadd.xlane.f32.xlu1 %v910_v52 }
 0xcdb   :  { %917 = vrot.lane.b32.xlu0 %v1681_v50, %s1383_s14  ;;  %v50_v50 = vld [vmem:[%s1872_s2 + $0x20] sm:$0xff]  ;;  %s1384_s2 = smov [#allocation2]  }
 0xcdc   :  { %s1230_s23 = sshll.u32 %s1384_s2, 4  ;;  %s1231_s23 = int_to_ptr.vmem [resolvable:$true] %s1230_s23 }
 0xce3   :  { %943 = vrot.lane.b32.xlu1 %v1696_v8, %s1383_s14  ;;  %v1029_v8 = vperm.slane %v1673_v37, 4 }
 0xd3a   :  { %v909_v54 = vpop.xlane.xlu0 %908 }
 0xd3b   :  { %1340 = vrcp.f32 %v909_v54 }
 0xd3d   :  { %v912_v55 = vpop.xlane.xlu1 %911 }
 0xd3e   :  { %1342 = vrcp.f32 %v912_v55 }
 0xd41   :  { %v1341_v56 = vpop.eup %1340 }
 0xd42   :  { %v915_v57 = vmul.f32 %v1341_v56, %v1337_v46  ;;  %v1076_v56 = vperm.slane %v1673_v37, 2 }
 0xd44   :  { %v1343_v60 = vpop.eup %1342 }
 0xd45   :  { %v916_v61 = vmul.f32 %v1343_v60, %v1339_v51  ;;  %v1079_v60 = vperm.slane %v1673_v37, 3 }
 0xd4a   :  { %v834_v1 = vpop.f32.mrf.mxu3 }
 0xd4d   :  { %v918_v58 = vpop.permute.xlu0 %917 }
 0xd4e   :  { %938 = vmatpush.msra.mxu3 %v918_v58 }
 0xd4f   :  { %1276 = vmatmul.msk.f32.vlgmr.msra.gmra.mxu3 %vm248_vm9, %v915_v57  ;;  %v88_v57 = vld [vmem:[%s1876_s6 + $0xb0] sm:$0xff] }
 0xd50   :  { %1018 = vmatpush.msrb.mxu3 %v51_v59 }
 0xd52   :  { %1019 = vmatpush.msrb.mxu3 %v50_v50 }
 0xd55   :  { %v944_v63 = vpop.permute.xlu1 %943 }
 0xd56   :  { %964 = vmatpush.msra.mxu2 %v944_v63 }
 0xd57   :  { %1277 = vmatmul.msk.f32.vlgmr.msra.gmra.mxu2 %vm248_vm9, %v916_v61  ;;  %1280 = vmatmul.msk.f32.vlgmr.msrb.gmra.mxu3 %vm194_vm8, %v808_v27  ;;  %v63_v27 = vld [vmem:[%s1874_s4 + $0x38] sm:$0xff]  ;;  %v87_v61 = vld [vmem:[%s1876_s6 + $0xa8] sm:$0xff] }
 0xd58   :  { %1103 = vmatpush.msrb.mxu1 %v63_v27  ;;  %1117 = vmatpush.msrb.mxu2 %v97_v35 }
 0xd5a   :  { %1104 = vmatpush.msrb.mxu1 %v62_v28  ;;  %1118 = vmatpush.msrb.mxu2 %v96_v36 }
 0xd5c   :  { %1105 = vmatpush.msrb.mxu1 %v61_v29  ;;  %1119 = vmatpush.msrb.mxu2 %v95_v38 }
 0xd5e   :  { %1106 = vmatpush.msrb.mxu1 %v60_v30  ;;  %1120 = vmatpush.msrb.mxu2 %v94_v41  ;;  %v101_v41 = vld [vmem:[%s1878_s8 + $0x10] sm:$0xff] }
 0xd5f   :  { %1281 = vmatmul.msk.f32.gmra.mxu3 %vm194_vm8, %v834_v1 }
 0xd60   :  { %1121 = vmatpush.msrb.mxu2 %v93_v43 }
 0xd62   :  { %1122 = vmatpush.msrb.mxu2 %v92_v45 }
 0xd64   :  { %1123 = vmatpush.msrb.mxu2 %v91_v47 }
 0xd66   :  { %1124 = vmatpush.msrb.mxu2 %v90_v49 }
 0xd68   :  { %1125 = vmatpush.msrb.mxu2 %v89_v53 }
 0xd6a   :  { %1126 = vmatpush.msrb.mxu2 %v88_v57 }
 0xd6c   :  { %1127 = vmatpush.msrb.mxu2 %v87_v61 }
 0xd6e   :  { %1128 = vmatpush.msrb.mxu2 %v86_v2 }
 0xdd2   :  { %v940_v4 = vpop.f32.mrf.mxu3 }
 0xdd3   :  { %1278 = vmatmul.msk.f32.vlgmr.msrb.gmra.mxu0 %vm194_vm8, %v940_v4 }
 0xdda   :  { %v966_v5 = vpop.f32.mrf.mxu2  ;;  %v1021_v6 = vpop.f32.mrf.mxu3 }
 0xddb   :  { %1279 = vmatmul.msk.f32.gmra.mxu0 %vm194_vm8, %v966_v5 }
 0xde2   :  { %v1024_v14 = vpop.f32.mrf.mxu3 }
 0xe50   :  { %v992_v7 = vpop.f32.mrf.mxu0 }
 0xe51   :  { %v1022_v0 = vadd.f32 %v1021_v6, %v992_v7  ;;  %v85_v6 = vld [vmem:[%s1876_s6 + $0x98] sm:$0xff] }
 0xe52   :  { %1129 = vmatpush.msrb.mxu2 %v85_v6 }
 0xe53   :  { %v1027_v9 = vadd.f32 %v1022_v0, %v1645_v13 }
 0xe55   :  { %v1747_v11 = vadd.f32 %v1029_v8, %v1027_v9 }
 0xe57   :  { %v1032_v12 = vsel %vm104_vm0, %v1747_v11, 0.0 }
 0xe58   :  { %1033 = vadd.xlane.f32.xlu2 %v1032_v12  ;;  %v995_v15 = vpop.f32.mrf.mxu0 }
 0xe59   :  { %v1025_v16 = vadd.f32 %v1024_v14, %v995_v15  ;;  %v84_v14 = vld [vmem:[%s1876_s6 + $0x90] sm:$0xff]  ;;  %v83_v15 = vld [vmem:[%s1876_s6 + $0x88] sm:$0xff] }
 0xe5a   :  { %1130 = vmatpush.msrb.mxu2 %v84_v14 }
 0xe5b   :  { %v1028_v17 = vadd.f32 %v1025_v16, %v1666_v34  ;;  %v82_v16 = vld [vmem:[%s1876_s6 + $0x80] sm:$0xff] }
 0xe5c   :  { %1131 = vmatpush.msrb.mxu2 %v83_v15 }
 0xe5d   :  { %v1752_v18 = vadd.f32 %v1029_v8, %v1028_v17  ;;  %v1296_v17 = vld [vmem:[%s1875_s5 + $0x1] ss:$0 sm:$0xff] }
 0xe5e   :  { %1132 = vmatpush.msrb.mxu2 %v82_v16 }
 0xe5f   :  { %v1035_v19 = vsel %vm104_vm0, %v1752_v18, 0.0 }
 0xe60   :  { %1036 = vadd.xlane.f32.xlu0 %v1035_v19 }
 0xecb   :  { %v1034_v20 = vpop.xlane.xlu2 %1033 }
 0xecc   :  { %v1038_v13 = vmul.f32 %v1034_v20, %v1456_v10 }
 0xece   :  { %v1040_v21 = vsub.f32 %v1747_v11, %v1038_v13 }
 0xed0   :  { %v1042_v33 = vmul.f32 %v1040_v21, %v1040_v21 }
 0xed2   :  { %v1044_v62 = vsel %vm104_vm0, %v1042_v33, 0.0 }
 0xed3   :  { %1045 = vadd.xlane.f32.xlu1 %v1044_v62  ;;  %v1037_v23 = vpop.xlane.xlu0 %1036 }
 0xed4   :  { %v1039_v24 = vmul.f32 %v1037_v23, %v1456_v10  ;;  %v1116_v23 = vperm.slane %v1673_v37, 5 }
 0xed6   :  { %v1761_v34 = vsub.f32 %v1752_v18, %v1039_v24 }
 0xed8   :  { %v1043_v25 = vmul.f32 %v1761_v34, %v1761_v34 }
 0xeda   :  { %v1047_v26 = vsel %vm104_vm0, %v1043_v25, 0.0 }
 0xedb   :  { %1048 = vadd.xlane.f32.xlu2 %v1047_v26 }
 0xf46   :  { %v1046_v3 = vpop.xlane.xlu1 %1045 }
 0xf47   :  { %v1050_v31 = vmul.f32 %v1046_v3, %v1456_v10 }
 0xf49   :  { %v1052_v32 = vadd.f32 1e-05, %v1050_v31 }
 0xf4b   :  { %1344 = vrsqrt.f32 %v1052_v32  ;;  %vm1060_vm8 = vweird.f32 %v1052_v32 }
 0xf4e   :  { %v1049_v39 = vpop.xlane.xlu2 %1048 }
 0xf4f   :  { %v1051_v40 = vmul.f32 %v1049_v39, %v1456_v10 }
 0xf51   :  { %v1345_v22 = vpop.eup %1344  ;;  %v1053_v42 = vadd.f32 1e-05, %v1051_v40 }
 0xf52   :  { %v1055_v44 = vmul.f32 %v1345_v22, %v1052_v32  ;;  %vm1061_vm7 = vweird.f32 %v1345_v22 }
 0xf53   :  { %1346 = vrsqrt.f32 %v1053_v42  ;;  %vm1062_vm9 = vmor %vm1060_vm8, %vm1061_vm7  ;;  %vm1070_vm11 = vweird.f32 %v1053_v42 }
 0xf54   :  { %v1056_v46 = vmul.f32 %v1345_v22, %v1055_v44 }
 0xf56   :  { %v1057_v48 = vmul.f32 0.5, %v1056_v46 }
 0xf58   :  { %v1058_v51 = vsub.f32 1.5, %v1057_v48 }
 0xf59   :  { %v1347_v52 = vpop.eup %1346 }
 0xf5a   :  { %v1059_v54 = vmul.f32 %v1345_v22, %v1058_v51  ;;  %v1065_v55 = vmul.f32 %v1347_v52, %v1053_v42  ;;  %vm1071_vm10 = vweird.f32 %v1347_v52  ;;  %v99_v42 = vld [vmem:[%s1878_s8] sm:$0xff] }
 0xf5b   :  { %vm1072_vm12 = vmor %vm1070_vm11, %vm1071_vm10 }
 0xf5c   :  { %v1063_v58 = vsel %vm1062_vm9, %v1345_v22, %v1059_v54  ;;  %v1066_v59 = vmul.f32 %v1347_v52, %v1065_v55  ;;  %v100_v22 = vld [vmem:[%s1878_s8 + $0x8] sm:$0xff]  ;;  %v98_v54 = vld [vmem:[%s1877_s7] sm:$0x3] }
 0xf5d   :  { %v1074_v50 = vmul.f32 %v1063_v58, %v1040_v21  ;;  %v1189_v61 = vperm.slane %v98_v54, 1 }
 0xf5e   :  { %v1067_v63 = vmul.f32 0.5, %v1066_v59  ;;  %v1186_v59 = vperm.slane %v98_v54, 0 }
 0xf5f   :  { %v1077_v1 = vmul.f32 %v1076_v56, %v1074_v50 }
 0xf60   :  { %v1068_v4 = vsub.f32 1.5, %v1067_v63 }
 0xf61   :  { %v1080_v5 = vadd.f32 %v1079_v60, %v1077_v1 }
 0xf62   :  { %v1069_v7 = vmul.f32 %v1347_v52, %v1068_v4 }
 0xf63   :  { %1282 = vmatmul.msk.f32.vlgmr.msrb.gmra.mxu1 %vm104_vm0, %v1080_v5 }
 0xf64   :  { %v1073_v0 = vsel %vm1072_vm12, %v1347_v52, %v1069_v7 }
 0xf65   :  { %v1075_v8 = vmul.f32 %v1073_v0, %v1761_v34 }
 0xf67   :  { %v1078_v9 = vmul.f32 %v1076_v56, %v1075_v8 }
 0xf69   :  { %v1081_v12 = vadd.f32 %v1079_v60, %v1078_v9  ;;  %v1297_v9 = vld [vmem:[%s1879_s9] ss:$0 sm:$0xff] }
 0xf6b   :  { %1283 = vmatmul.msk.f32.gmra.mxu1 %vm104_vm0, %v1081_v12 }
 0xfe0   :  { %v1108_v19 = vpop.f32.mrf.mxu1 }
 0xfe1   :  { %v1109_v20 = vadd.f32 %v1296_v17, %v1108_v19 }
 0xfe3   :  { %v1114_v13 = vmax.f32 %v1109_v20, 0.0 }
 0xfe5   :  { %1133 = vmatmul.f32.vlgmr.msrb.gmra.mxu2 %v1114_v13 }
 0xfe8   :  { %v1111_v21 = vpop.f32.mrf.mxu1 }
 0xfe9   :  { %v1112_v33 = vadd.f32 %v1296_v17, %v1111_v21 }
 0xfeb   :  { %v1115_v62 = vmax.f32 %v1112_v33, 0.0 }
 0xfed   :  { %1136 = vmatmul.f32.gmra.mxu2 %v1115_v62 }
0x1068   :  { %v1134_v24 = vpop.f32.mrf.mxu2 }
0x1069   :  { %v1135_v34 = vadd.f32 %v1134_v24, %v1116_v23 }
0x106b   :  { %v1140_v25 = vadd.f32 %v1135_v34, %v1747_v11 }
0x106d   :  { %v1142_v26 = vsel %vm104_vm0, %v1140_v25, 0.0 }
0x106e   :  { %1143 = vadd.xlane.f32.xlu0 %v1142_v26 }
0x1070   :  { %v1137_v27 = vpop.f32.mrf.mxu2 }
0x1071   :  { %v1138_v28 = vadd.f32 %v1137_v27, %v1116_v23 }
0x1073   :  { %v1141_v29 = vadd.f32 %v1138_v28, %v1752_v18  ;;  %v102_v18 = vld [vmem:[%s1878_s8 + $0x18] sm:$0xff] }
0x1074   :  { %1213 = vmatpush.msra.mxu0 %v102_v18 }
0x1075   :  { %v1145_v30 = vsel %vm104_vm0, %v1141_v29, 0.0 }
0x1076   :  { %1146 = vadd.xlane.f32.xlu2 %v1145_v30  ;;  %1214 = vmatpush.msra.mxu0 %v101_v41 }
0x1078   :  { %1215 = vmatpush.msra.mxu0 %v100_v22 }
0x107a   :  { %1216 = vmatpush.msra.mxu0 %v99_v42 }
0x10e1   :  { %v1144_v3 = vpop.xlane.xlu0 %1143 }
0x10e2   :  { %v1148_v31 = vmul.f32 %v1144_v3, %v1456_v10 }
0x10e4   :  { %v1150_v32 = vsub.f32 %v1140_v25, %v1148_v31 }
0x10e6   :  { %v1152_v35 = vmul.f32 %v1150_v32, %v1150_v32 }
0x10e8   :  { %v1154_v37 = vsel %vm104_vm0, %v1152_v35, 0.0 }
0x10e9   :  { %v1147_v36 = vpop.xlane.xlu2 %1146  ;;  %1155 = vadd.xlane.f32.xlu0 %v1154_v37 }
0x10ea   :  { %v1149_v11 = vmul.f32 %v1147_v36, %v1456_v10 }
0x10ec   :  { %v1151_v38 = vsub.f32 %v1141_v29, %v1149_v11 }
0x10ee   :  { %v1153_v39 = vmul.f32 %v1151_v38, %v1151_v38 }
0x10f0   :  { %v1157_v40 = vsel %vm104_vm0, %v1153_v39, 0.0 }
0x10f1   :  { %1158 = vadd.xlane.f32.xlu1 %v1157_v40 }
0x115c   :  { %v1156_v43 = vpop.xlane.xlu0 %1155 }
0x115d   :  { %v1160_v44 = vmul.f32 %v1156_v43, %v1456_v10 }
0x115f   :  { %v1162_v45 = vadd.f32 1e-05, %v1160_v44 }
0x1161   :  { %1348 = vrsqrt.f32 %v1162_v45  ;;  %vm1170_vm14 = vweird.f32 %v1162_v45 }
0x1164   :  { %v1159_v46 = vpop.xlane.xlu1 %1158 }
0x1165   :  { %v1161_v47 = vmul.f32 %v1159_v46, %v1456_v10 }
0x1167   :  { %v1349_v48 = vpop.eup %1348  ;;  %v1163_v49 = vadd.f32 1e-05, %v1161_v47 }
0x1168   :  { %v1165_v51 = vmul.f32 %v1349_v48, %v1162_v45  ;;  %vm1171_vm13 = vweird.f32 %v1349_v48 }
0x1169   :  { %1350 = vrsqrt.f32 %v1163_v49  ;;  %vm1172_vm15 = vmor %vm1170_vm14, %vm1171_vm13  ;;  %vm1180_vm2 = vweird.f32 %v1163_v49 }
0x116a   :  { %v1166_v52 = vmul.f32 %v1349_v48, %v1165_v51 }
0x116c   :  { %v1167_v53 = vmul.f32 0.5, %v1166_v52 }
0x116e   :  { %v1168_v55 = vsub.f32 1.5, %v1167_v53 }
0x116f   :  { %v1351_v56 = vpop.eup %1350 }
0x1170   :  { %v1169_v57 = vmul.f32 %v1349_v48, %v1168_v55  ;;  %v1175_v58 = vmul.f32 %v1351_v56, %v1163_v49  ;;  %vm1181_vm1 = vweird.f32 %v1351_v56 }
0x1171   :  { %vm1182_vm3 = vmor %vm1180_vm2, %vm1181_vm1 }
0x1172   :  { %v1173_v50 = vsel %vm1172_vm15, %v1349_v48, %v1169_v57  ;;  %v1176_v10 = vmul.f32 %v1351_v56, %v1175_v58 }
0x1173   :  { %v1184_v60 = vmul.f32 %v1173_v50, %v1150_v32 }
0x1174   :  { %v1177_v63 = vmul.f32 0.5, %v1176_v10 }
0x1175   :  { %v1187_v1 = vmul.f32 %v1186_v59, %v1184_v60 }
0x1176   :  { %v1178_v2 = vsub.f32 1.5, %v1177_v63 }
0x1177   :  { %v1190_v4 = vadd.f32 %v1189_v61, %v1187_v1 }
0x1178   :  { %v1179_v5 = vmul.f32 %v1351_v56, %v1178_v2 }
0x1179   :  { %1284 = vmatmul.msk.f32.vlgmr.msra.gmra.mxu0 %vm104_vm0, %v1190_v4 }
0x117a   :  { %v1183_v6 = vsel %vm1182_vm3, %v1351_v56, %v1179_v5 }
0x117b   :  { %v1185_v7 = vmul.f32 %v1183_v6, %v1151_v38 }
0x117d   :  { %v1188_v0 = vmul.f32 %v1186_v59, %v1185_v7 }
0x117f   :  { %v1191_v8 = vadd.f32 %v1189_v61, %v1188_v0 }
0x1181   :  { %1285 = vmatmul.msk.f32.gmra.mxu0 %vm104_vm0, %v1191_v8 }
0x11f6   :  { %v1218_v12 = vpop.f32.mrf.mxu0 }
0x11f7   :  { %v1219_v14 = vadd.f32 %v1297_v9, %v1218_v12 }
0x11f9   :  { %1224 = vst [vmem:[#allocation2] sm:$0xff] %v1219_v14 }
0x11fe   :  { %v1221_v15 = vpop.f32.mrf.mxu0 }
0x11ff   :  { %v1222_v16 = vadd.f32 %v1297_v9, %v1221_v15 }
0x1201   :  { %1225 = vst [vmem:[#allocation2 + $0x8] sm:$0xff] %v1222_v16 }
0x1202   :  { %1238 = dma.vmem_to_hbm [thread:$0]  %s1231_s23, 256, %s1233_s30, [#allocation3], %s1385_s11, %s1385_s11, %s1386_s12  }
0x1203   :  { %1376 = dma.done.wait [#allocation3], 256  }
0x1204   :  { %1377 = vsyncadd [#allocation3], 4294967040 }
0x1205   :  { %1243 = vsyncpa [#allocation3], 1 }

</bundles_post_ra>
